<compile_context>
chip_gen: v6e
topology: v6e:2x2x1
jax: 0.10.0
libtpu: 0.0.40
codegen_flags: <defaults>
</compile_context>

<pallas_src>
import jax
import jax.numpy as jnp
from jax import lax
from jax.experimental import pallas as pl
from jax.experimental.pallas import tpu as pltpu


# ---------------------------------------------------------------------------
# math helpers (shared by the kernel and the pure-JAX reference)
# ---------------------------------------------------------------------------
def _leaky_relu(x, negative_slope=0.2):
    return jnp.where(x > 0, x, negative_slope * x)


def _relu(x):
    return jnp.maximum(x, 0.0)


def _softplus(x):
    # numerically stable log(1 + exp(x)) using only exp/log (Mosaic-friendly)
    return jnp.maximum(x, 0.0) + jnp.log(1.0 + jnp.exp(-jnp.abs(x)))


def _bf16_dot(a, w):
    # bf16 operands on the MXU, f32 accumulation
    return jnp.dot(a.astype(jnp.bfloat16), w.astype(jnp.bfloat16),
                   preferred_element_type=jnp.float32)


# ---------------------------------------------------------------------------
# fused HGIB kernel: MINE(z1,z2) + CLUB(z1, mean(z1)) + CLUB(z2, mean(z2))
# outputs one (1,128) f32 slab:
#   lane 0: MI/Z1Z2   lane 1: MI/V1Z1   lane 2: MI/V2Z2
#   lane 3: Loss/MINE lane 4: Loss/CLUB1 lane 5: Loss/CLUB2
# ---------------------------------------------------------------------------
def _hgib_kernel(
    z1_ref, z2_ref,
    # MINE: Linear(d1+d2,256) -> LeakyReLU(0.2) -> Linear(256,256) -> LeakyReLU(0.2) -> Linear(256,1)
    mw1a_ref, mw1b_ref, mb1_ref, mw2_ref, mb2_ref, mw3_ref, mb3_ref,
    # CLUB1: Linear(d,256) -> ReLU -> Linear(256,256) -> ReLU -> Linear(256,2d) -> Tanh
    c1w1_ref, c1b1_ref, c1w2_ref, c1b2_ref, c1wmu_ref, c1bmu_ref, c1wlv_ref, c1blv_ref,
    # CLUB2 (same architecture)
    c2w1_ref, c2b1_ref, c2w2_ref, c2b2_ref, c2wmu_ref, c2bmu_ref, c2wlv_ref, c2blv_ref,
    out_ref,
):
    z1 = z1_ref[...]
    z2 = z2_ref[...]
    b = z1.shape[0]
    inv_b = 1.0 / b

    # ----------------------------- MINE ------------------------------------
    # shuffled batch == torch.roll(x2, shifts=1, dims=0): XLU sublane rotate.
    z2s = pltpu.roll(z2, shift=1, axis=0)
    z2_pair = jnp.concatenate([z2, z2s], axis=0)                         # (2B, d2)

    # cat([x1, x2]) @ W1 == x1 @ W1[:d1] + x2 @ W1[d1:]; x1 term shared by both branches.
    h1_z1 = _bf16_dot(z1, mw1a_ref[...])                                 # (B, 256)
    h1 = _leaky_relu(jnp.concatenate([h1_z1, h1_z1], axis=0)
                     + _bf16_dot(z2_pair, mw1b_ref[...]) + mb1_ref[...])  # (2B, 256)
    h2 = _leaky_relu(_bf16_dot(h1, mw2_ref[...]) + mb2_ref[...])         # (2B, 256)

    # 1-wide head: VPU multiply + lane reduce (bf16-round operands to match the
    # bf16-MXU reference head; accumulation in f32).
    w3 = mw3_ref[...].astype(jnp.float32)                                # (1, 256)
    h2r = h2.astype(jnp.bfloat16).astype(jnp.float32)
    score = jnp.sum(h2r * w3, axis=-1, keepdims=True) + mb3_ref[...]     # (2B, 1)
    pos = score[:b]                                                      # (B, 1)
    neg = score[b:]                                                      # (B, 1)

    mean_pos = jnp.sum(pos, axis=0, keepdims=True) * inv_b               # (1, 1)
    mean_exp_neg = jnp.sum(jnp.exp(neg), axis=0, keepdims=True) * inv_b  # (1, 1)
    mi_mine = mean_pos - jnp.log(mean_exp_neg)
    loss_mine = (jnp.sum(_softplus(-pos), axis=0, keepdims=True)
                 + jnp.sum(_softplus(neg), axis=0, keepdims=True)) * inv_b

    # ----------------------------- CLUB ------------------------------------
    def club(x, w1, b1, w2, b2, wmu, bmu, wlv, blv):
        # HGIB passes CLUB x2 = mean(x) broadcast over the batch, so only the (1,d)
        # mean row is needed.  All x2 rows are identical, hence
        # mean_j (mu_i - x2_j)^2 == (mu_i - m)^2  ->  pos == neg and MI == 0 exactly.
        m = jnp.sum(x, axis=0, keepdims=True) * inv_b                    # (1, d)
        g1 = _relu(_bf16_dot(x, w1) + b1)                                # (B, 256)
        g2 = _relu(_bf16_dot(g1, w2) + b2)                               # (B, 256)
        mu = jnp.tanh(_bf16_dot(g2, wmu) + bmu)                          # (B, d)
        logvar = jnp.tanh(_bf16_dot(g2, wlv) + blv)                      # (B, d)
        inv_var = jnp.exp(-logvar)
        sq = (mu - m) * (mu - m)
        # loss = mean_i sum_d ( (mu - x2)^2 / var + logvar )
        ll = sq * inv_var + logvar
        loss = jnp.sum(jnp.sum(ll, axis=-1, keepdims=True),
                       axis=0, keepdims=True) * inv_b                    # (1, 1)
        mi = jnp.zeros((1, 1), jnp.float32)                              # pos == neg
        return mi, loss

    mi_c1, loss_c1 = club(z1, c1w1_ref[...], c1b1_ref[...], c1w2_ref[...],
                          c1b2_ref[...], c1wmu_ref[...], c1bmu_ref[...],
                          c1wlv_ref[...], c1blv_ref[...])
    mi_c2, loss_c2 = club(z2, c2w1_ref[...], c2b1_ref[...], c2w2_ref[...],
                          c2b2_ref[...], c2wmu_ref[...], c2bmu_ref[...],
                          c2wlv_ref[...], c2blv_ref[...])

    # --------------- pack the 6 scalars into one lane-dense row -------------
    lane = lax.broadcasted_iota(jnp.int32, (1, 128), 1)
    slab = jnp.where(lane == 0, mi_mine,
           jnp.where(lane == 1, mi_c1,
           jnp.where(lane == 2, mi_c2,
           jnp.where(lane == 3, loss_mine,
           jnp.where(lane == 4, loss_c1,
           jnp.where(lane == 5, loss_c2, 0.0))))))
    out_ref[...] = slab


# ---------------------------------------------------------------------------
# wrapper
# ---------------------------------------------------------------------------
def _vmem_specs(n):
    return [pl.BlockSpec(memory_space=pltpu.MemorySpace.VMEM) for _ in range(n)]


_COMPILER_PARAMS = pltpu.CompilerParams(vmem_limit_bytes=32 * 1024 * 1024)


def hgib_forward(x1, x2, prepared, beta=0.01):
    """HGIB.forward: returns (mi_z1z2, scalars dict). One fused pallas_call."""
    z1, z2 = x1, x2                                   # identity encoders (see TODO above)
    m, c1, c2 = prepared["mine"], prepared["club1"], prepared["club2"]
    operands = (
        z1, z2,
        m["w1a"], m["w1b"], m["b1"], m["w2"], m["b2"], m["w3row"], m["b3"],
        c1["w1"], c1["b1"], c1["w2"], c1["b2"], c1["wmu"], c1["bmu"], c1["wlv"], c1["blv"],
        c2["w1"], c2["b1"], c2["w2"], c2["b2"], c2["wmu"], c2["bmu"], c2["wlv"], c2["blv"],
    )
    out = pl.pallas_call(
        _hgib_kernel,
        out_shape=jax.ShapeDtypeStruct((1, 128), jnp.float32),
        in_specs=_vmem_specs(len(operands)),
        out_specs=pl.BlockSpec(memory_space=pltpu.MemorySpace.VMEM),
        compiler_params=_COMPILER_PARAMS,
    )(*operands)

    mi_z1z2, mi_v1z1, mi_v2z2 = out[0, 0], out[0, 1], out[0, 2]
    loss_mine, loss_c1, loss_c2 = out[0, 3], out[0, 4], out[0, 5]
    scalars = {
        "MI/Z1Z2": mi_z1z2,
        "MI/V1Z1": mi_v1z1,
        "MI/V2Z2": mi_v2z2,
        "Loss/MINE": loss_mine,
        "Loss/CLUBNet1": loss_c1,
        "Loss/CLUBNet2": loss_c2,
        "Loss/Total": loss_mine + beta * (loss_c1 + loss_c2),
    }
    return mi_z1z2, scalars


# ---------------------------------------------------------------------------
# parameter init (PyTorch nn.Linear-style; W stored (in, out), bf16; bias f32)
# and one-time kernel-layout preparation (all static prep hoisted out of forward)
# ---------------------------------------------------------------------------
def _init_linear(key, fan_in, fan_out):
    kw, kb = jax.random.split(key)
    bound = 1.0 / float(fan_in) ** 0.5
    w = jax.random.uniform(kw, (fan_in, fan_out), jnp.float32, -bound, bound)
    b = jax.random.uniform(kb, (1, fan_out), jnp.float32, -bound, bound)
    return w.astype(jnp.bfloat16), b


def init_hgib_params(key, x1_dim, x2_dim, hidden_dims=(256, 256)):
    def mlp(key, dims):
        layers = []
        for din, dout in zip(dims[:-1], dims[1:]):
            key, sub = jax.random.split(key)
            layers.append(_init_linear(sub, din, dout))
        return layers

    k0, k1, k2 = jax.random.split(key, 3)
    mine_dims = (x1_dim + x2_dim,) + tuple(hidden_dims) + (1,)
    club_dims = (x1_dim,) + tuple(hidden_dims) + (2 * x2_dim,)
    return {"mine": mlp(k0, mine_dims),
            "club1": mlp(k1, club_dims),
            "club2": mlp(k2, club_dims)}


def prepare_hgib_params(params, x1_dim, x2_dim):
    """One-time layout prep so the per-call wrapper issues no preprocessing ops."""
    (mw1, mb1), (mw2, mb2), (mw3, mb3) = params["mine"]
    mine = dict(w1a=mw1[:x1_dim], w1b=mw1[x1_dim:], b1=mb1, w2=mw2, b2=mb2,
                w3row=mw3.T,                # (1, 256) bf16 head row (VPU+lane-reduce head)
                b3=mb3)                     # (1, 1) f32

    def club(p):
        (w1, b1), (w2, b2), (w3, b3) = p    # == torch.chunk(gaussian(x1), 2, -1)
        return dict(w1=w1, b1=b1, w2=w2, b2=b2,
                    wmu=w3[:, :x2_dim], bmu=b3[:, :x2_dim],
                    wlv=w3[:, x2_dim:], blv=b3[:, x2_dim:])

    return {"mine": mine,
            "club1": club(params["club1"]),
            "club2": club(params["club2"])}


# ---------------------------------------------------------------------------
# pure-JAX reference (mirrors the PyTorch forward, same bf16 matmul pipeline)
# ---------------------------------------------------------------------------
def _ref_mine(z1, z2, params):
    (w1, b1), (w2, b2), (w3, b3) = params

    def net(x):
        h = _leaky_relu(_bf16_dot(x, w1) + b1)
        h = _leaky_relu(_bf16_dot(h, w2) + b2)
        return _bf16_dot(h, w3) + b3

    pos = net(jnp.concatenate([z1, z2], axis=-1))
    neg = net(jnp.concatenate([z1, jnp.roll(z2, 1, axis=0)], axis=-1))
    loss = jnp.mean(_softplus(-pos)) + jnp.mean(_softplus(neg))
    mi = jnp.mean(pos) - jnp.log(jnp.mean(jnp.exp(neg)))
    return mi, loss


def _ref_club(x1, x2, params):
    (w1, b1), (w2, b2), (w3, b3) = params
    h = _relu(_bf16_dot(x1, w1) + b1)
    h = _relu(_bf16_dot(h, w2) + b2)
    g = jnp.tanh(_bf16_dot(h, w3) + b3)
    d = x2.shape[-1]
    mu, logvar = g[:, :d], g[:, d:]
    var = jnp.exp(logvar)
    loss = jnp.mean(jnp.sum((mu - x2) ** 2 / var + logvar, axis=-1))
    pos = -0.5 * (mu - x2) ** 2 / var
    neg = -0.5 * jnp.mean((mu[:, None, :] - x2[None, :, :]) ** 2, axis=1) / var
    mi = jnp.mean(jnp.sum(pos, axis=-1) - jnp.sum(neg, axis=-1))
    return mi, loss


def _ref_hgib(x1, x2, params):
    z1, z2 = x1, x2
    v1 = jnp.broadcast_to(jnp.mean(z1, axis=0, keepdims=True), z1.shape)
    v2 = jnp.broadcast_to(jnp.mean(z2, axis=0, keepdims=True), z2.shape)
    mi_z1z2, l0 = _ref_mine(z1, z2, params["mine"])
    mi_v1z1, l1 = _ref_club(z1, v1, params["club1"])
    mi_v2z2, l2 = _ref_club(z2, v2, params["club2"])
    return mi_z1z2, mi_v1z1, mi_v2z2, l0, l1, l2


# ---------------------------------------------------------------------------
if __name__ == "__main__":
    B = 8                   # one sublane tile
    x1_dim = 128            # lane-dense; HGIB's v1/v2 construction requires x1_dim == x2_dim
    x2_dim = 128
    hidden_dims = (256, 256)
    beta = 0.01

    key = jax.random.PRNGKey(0)
    key, kx1, kx2 = jax.random.split(key, 3)
    x1 = jax.random.normal(kx1, (B, x1_dim), jnp.float32)
    x2 = jax.random.normal(kx2, (B, x2_dim), jnp.float32)

    params = init_hgib_params(key, x1_dim, x2_dim, hidden_dims)
    prepared = prepare_hgib_params(params, x1_dim, x2_dim)   # one-time prep, not per call

    mi, scalars = hgib_forward(x1, x2, prepared, beta=beta)
    mi = jax.block_until_ready(mi)

    ref_mi, ref_mi1, ref_mi2, ref_l0, ref_l1, ref_l2 = _ref_hgib(x1, x2, params)
    ref_total = ref_l0 + beta * (ref_l1 + ref_l2)

    def close(a, b, atol=2e-3, rtol=2e-3):
        return bool(jnp.allclose(a, b, atol=atol, rtol=rtol))

    assert close(mi, ref_mi), ("MI/Z1Z2 mismatch", mi, ref_mi)
    assert close(scalars["MI/V1Z1"], ref_mi1), ("MI/V1Z1 mismatch", scalars["MI/V1Z1"], ref_mi1)
    assert close(scalars["MI/V2Z2"], ref_mi2), ("MI/V2Z2 mismatch", scalars["MI/V2Z2"], ref_mi2)
    assert close(scalars["Loss/MINE"], ref_l0), ("Loss/MINE mismatch", scalars["Loss/MINE"], ref_l0)
    assert close(scalars["Loss/CLUBNet1"], ref_l1), ("Loss/CLUBNet1 mismatch",
                                                     scalars["Loss/CLUBNet1"], ref_l1)
    assert close(scalars["Loss/CLUBNet2"], ref_l2), ("Loss/CLUBNet2 mismatch",
                                                     scalars["Loss/CLUBNet2"], ref_l2)
    assert close(scalars["Loss/Total"], ref_total), ("Loss/Total mismatch",
                                                     scalars["Loss/Total"], ref_total)

    print("KERNEL_OK")
</pallas_src>

<mosaic_0001>
module attributes {stable_mosaic.version = 11 : i64} {
  func.func @_hgib_kernel(%arg0: memref<8x128xf32, #tpu.memory_space<vmem>>, %arg1: memref<8x128xf32, #tpu.memory_space<vmem>>, %arg2: memref<128x256xbf16, #tpu.memory_space<vmem>>, %arg3: memref<128x256xbf16, #tpu.memory_space<vmem>>, %arg4: memref<1x256xf32, #tpu.memory_space<vmem>>, %arg5: memref<256x256xbf16, #tpu.memory_space<vmem>>, %arg6: memref<1x256xf32, #tpu.memory_space<vmem>>, %arg7: memref<1x256xbf16, #tpu.memory_space<vmem>>, %arg8: memref<1x1xf32, #tpu.memory_space<vmem>>, %arg9: memref<128x256xbf16, #tpu.memory_space<vmem>>, %arg10: memref<1x256xf32, #tpu.memory_space<vmem>>, %arg11: memref<256x256xbf16, #tpu.memory_space<vmem>>, %arg12: memref<1x256xf32, #tpu.memory_space<vmem>>, %arg13: memref<256x128xbf16, #tpu.memory_space<vmem>>, %arg14: memref<1x128xf32, #tpu.memory_space<vmem>>, %arg15: memref<256x128xbf16, #tpu.memory_space<vmem>>, %arg16: memref<1x128xf32, #tpu.memory_space<vmem>>, %arg17: memref<128x256xbf16, #tpu.memory_space<vmem>>, %arg18: memref<1x256xf32, #tpu.memory_space<vmem>>, %arg19: memref<256x256xbf16, #tpu.memory_space<vmem>>, %arg20: memref<1x256xf32, #tpu.memory_space<vmem>>, %arg21: memref<256x128xbf16, #tpu.memory_space<vmem>>, %arg22: memref<1x128xf32, #tpu.memory_space<vmem>>, %arg23: memref<256x128xbf16, #tpu.memory_space<vmem>>, %arg24: memref<1x128xf32, #tpu.memory_space<vmem>>, %arg25: memref<1x128xf32, #tpu.memory_space<vmem>>) attributes {dimension_semantics = [], scalar_prefetch = 0 : i64, scratch_operands = 0 : i64, tpu.core_type = #tpu.core_type<tc>} {
    %c0 = arith.constant 0 : index
    %c0_0 = arith.constant 0 : index
    %0 = vector.load %arg0[%c0, %c0_0] : memref<8x128xf32, #tpu.memory_space<vmem>>, vector<8x128xf32>
    %c0_1 = arith.constant 0 : index
    %c0_2 = arith.constant 0 : index
    %1 = vector.load %arg1[%c0_1, %c0_2] : memref<8x128xf32, #tpu.memory_space<vmem>>, vector<8x128xf32>
    %c1_i32 = arith.constant 1 : i32
    %2 = tpu.dynamic_rotate %1 by %c1_i32 dim 0 : vector<8x128xf32>, i32 -> vector<8x128xf32>
    %3 = tpu.concatenate %1, %2 in 0 : vector<8x128xf32>, vector<8x128xf32> -> vector<16x128xf32>
    %c0_3 = arith.constant 0 : index
    %c0_4 = arith.constant 0 : index
    %4 = vector.load %arg2[%c0_3, %c0_4] : memref<128x256xbf16, #tpu.memory_space<vmem>>, vector<128x256xbf16>
    %5 = arith.truncf %0 : vector<8x128xf32> to vector<8x128xbf16>
    %cst = arith.constant dense<0.000000e+00> : vector<8x256xf32>
    %6 = tpu.matmul %5, %4, %cst {dimension_numbers = #tpu.dot_dimension_numbers<[1], [0], [0], [1], [0, 0, 1, 1], [], []>} : vector<8x128xbf16>, vector<128x256xbf16>, vector<8x256xf32> -> vector<8x256xf32>
    %7 = tpu.concatenate %6, %6 in 0 : vector<8x256xf32>, vector<8x256xf32> -> vector<16x256xf32>
    %c0_5 = arith.constant 0 : index
    %c0_6 = arith.constant 0 : index
    %8 = vector.load %arg3[%c0_5, %c0_6] : memref<128x256xbf16, #tpu.memory_space<vmem>>, vector<128x256xbf16>
    %9 = arith.truncf %3 : vector<16x128xf32> to vector<16x128xbf16>
    %cst_7 = arith.constant dense<0.000000e+00> : vector<16x256xf32>
    %10 = tpu.matmul %9, %8, %cst_7 {dimension_numbers = #tpu.dot_dimension_numbers<[1], [0], [0], [1], [0, 0, 1, 1], [], []>} : vector<16x128xbf16>, vector<128x256xbf16>, vector<16x256xf32> -> vector<16x256xf32>
    %11 = arith.addf %7, %10 : vector<16x256xf32>
    %c0_8 = arith.constant 0 : index
    %c0_9 = arith.constant 0 : index
    %12 = vector.load %arg4[%c0_8, %c0_9] : memref<1x256xf32, #tpu.memory_space<vmem>>, vector<1x256xf32>
    %13 = vector.broadcast %12 : vector<1x256xf32> to vector<16x256xf32>
    %14 = arith.addf %11, %13 : vector<16x256xf32>
    %cst_10 = arith.constant 0.000000e+00 : f32
    %15 = vector.broadcast %cst_10 : f32 to vector<16x256xf32>
    %16 = arith.cmpf ogt, %14, %15 : vector<16x256xf32>
    %cst_11 = arith.constant 2.000000e-01 : f32
    %17 = vector.broadcast %cst_11 : f32 to vector<16x256xf32>
    %18 = arith.mulf %17, %14 : vector<16x256xf32>
    %19 = arith.select %16, %14, %18 : vector<16x256xi1>, vector<16x256xf32>
    %c0_12 = arith.constant 0 : index
    %c0_13 = arith.constant 0 : index
    %20 = vector.load %arg5[%c0_12, %c0_13] : memref<256x256xbf16, #tpu.memory_space<vmem>>, vector<256x256xbf16>
    %21 = arith.truncf %19 : vector<16x256xf32> to vector<16x256xbf16>
    %cst_14 = arith.constant dense<0.000000e+00> : vector<16x256xf32>
    %22 = tpu.matmul %21, %20, %cst_14 {dimension_numbers = #tpu.dot_dimension_numbers<[1], [0], [0], [1], [0, 0, 1, 1], [], []>} : vector<16x256xbf16>, vector<256x256xbf16>, vector<16x256xf32> -> vector<16x256xf32>
    %c0_15 = arith.constant 0 : index
    %c0_16 = arith.constant 0 : index
    %23 = vector.load %arg6[%c0_15, %c0_16] : memref<1x256xf32, #tpu.memory_space<vmem>>, vector<1x256xf32>
    %24 = vector.broadcast %23 : vector<1x256xf32> to vector<16x256xf32>
    %25 = arith.addf %22, %24 : vector<16x256xf32>
    %cst_17 = arith.constant 0.000000e+00 : f32
    %26 = vector.broadcast %cst_17 : f32 to vector<16x256xf32>
    %27 = arith.cmpf ogt, %25, %26 : vector<16x256xf32>
    %cst_18 = arith.constant 2.000000e-01 : f32
    %28 = vector.broadcast %cst_18 : f32 to vector<16x256xf32>
    %29 = arith.mulf %28, %25 : vector<16x256xf32>
    %30 = arith.select %27, %25, %29 : vector<16x256xi1>, vector<16x256xf32>
    %c0_19 = arith.constant 0 : index
    %c0_20 = arith.constant 0 : index
    %31 = vector.load %arg7[%c0_19, %c0_20] : memref<1x256xbf16, #tpu.memory_space<vmem>>, vector<1x256xbf16>
    %32 = arith.extf %31 : vector<1x256xbf16> to vector<1x256xf32>
    %33 = arith.truncf %30 : vector<16x256xf32> to vector<16x256xbf16>
    %34 = arith.extf %33 : vector<16x256xbf16> to vector<16x256xf32>
    %35 = vector.broadcast %32 : vector<1x256xf32> to vector<16x256xf32>
    %36 = arith.mulf %34, %35 : vector<16x256xf32>
    %cst_21 = arith.constant dense<0.000000e+00> : vector<16xf32>
    %37 = vector.multi_reduction <add>, %36, %cst_21 [1] : vector<16x256xf32> to vector<16xf32>
    %38 = vector.shape_cast %37 : vector<16xf32> to vector<16x1xf32>
    %c0_22 = arith.constant 0 : index
    %c0_23 = arith.constant 0 : index
    %39 = vector.load %arg8[%c0_22, %c0_23] : memref<1x1xf32, #tpu.memory_space<vmem>>, vector<1x1xf32>
    %40 = vector.broadcast %39 : vector<1x1xf32> to vector<16x1xf32>
    %41 = arith.addf %38, %40 : vector<16x1xf32>
    %42 = vector.extract_strided_slice %41 {offsets = [0, 0], sizes = [8, 1], strides = [1, 1]} : vector<16x1xf32> to vector<8x1xf32>
    %43 = vector.extract_strided_slice %41 {offsets = [8, 0], sizes = [8, 1], strides = [1, 1]} : vector<16x1xf32> to vector<8x1xf32>
    %cst_24 = arith.constant dense<0.000000e+00> : vector<1xf32>
    %44 = vector.multi_reduction <add>, %42, %cst_24 [0] : vector<8x1xf32> to vector<1xf32>
    %45 = vector.shape_cast %44 : vector<1xf32> to vector<1x1xf32>
    %cst_25 = arith.constant 1.250000e-01 : f32
    %46 = vector.broadcast %cst_25 : f32 to vector<1x1xf32>
    %47 = arith.mulf %45, %46 : vector<1x1xf32>
    %48 = math.exp %43 : vector<8x1xf32>
    %cst_26 = arith.constant dense<0.000000e+00> : vector<1xf32>
    %49 = vector.multi_reduction <add>, %48, %cst_26 [0] : vector<8x1xf32> to vector<1xf32>
    %50 = vector.shape_cast %49 : vector<1xf32> to vector<1x1xf32>
    %cst_27 = arith.constant 1.250000e-01 : f32
    %51 = vector.broadcast %cst_27 : f32 to vector<1x1xf32>
    %52 = arith.mulf %50, %51 : vector<1x1xf32>
    %53 = math.log %52 : vector<1x1xf32>
    %54 = arith.subf %47, %53 : vector<1x1xf32>
    %cst_28 = arith.constant 0.000000e+00 : f32
    %55 = vector.broadcast %cst_28 : f32 to vector<8x1xf32>
    %56 = arith.subf %55, %42 : vector<8x1xf32>
    %cst_29 = arith.constant 0.000000e+00 : f32
    %57 = vector.broadcast %cst_29 : f32 to vector<8x1xf32>
    %58 = arith.maximumf %56, %57 : vector<8x1xf32>
    %59 = math.absf %56 : vector<8x1xf32>
    %cst_30 = arith.constant 0.000000e+00 : f32
    %60 = vector.broadcast %cst_30 : f32 to vector<8x1xf32>
    %61 = arith.subf %60, %59 : vector<8x1xf32>
    %62 = math.exp %61 : vector<8x1xf32>
    %cst_31 = arith.constant 1.000000e+00 : f32
    %63 = vector.broadcast %cst_31 : f32 to vector<8x1xf32>
    %64 = arith.addf %63, %62 : vector<8x1xf32>
    %65 = math.log %64 : vector<8x1xf32>
    %66 = arith.addf %58, %65 : vector<8x1xf32>
    %cst_32 = arith.constant dense<0.000000e+00> : vector<1xf32>
    %67 = vector.multi_reduction <add>, %66, %cst_32 [0] : vector<8x1xf32> to vector<1xf32>
    %68 = vector.shape_cast %67 : vector<1xf32> to vector<1x1xf32>
    %cst_33 = arith.constant 0.000000e+00 : f32
    %69 = vector.broadcast %cst_33 : f32 to vector<8x1xf32>
    %70 = arith.maximumf %43, %69 : vector<8x1xf32>
    %71 = math.absf %43 : vector<8x1xf32>
    %cst_34 = arith.constant 0.000000e+00 : f32
    %72 = vector.broadcast %cst_34 : f32 to vector<8x1xf32>
    %73 = arith.subf %72, %71 : vector<8x1xf32>
    %74 = math.exp %73 : vector<8x1xf32>
    %cst_35 = arith.constant 1.000000e+00 : f32
    %75 = vector.broadcast %cst_35 : f32 to vector<8x1xf32>
    %76 = arith.addf %75, %74 : vector<8x1xf32>
    %77 = math.log %76 : vector<8x1xf32>
    %78 = arith.addf %70, %77 : vector<8x1xf32>
    %cst_36 = arith.constant dense<0.000000e+00> : vector<1xf32>
    %79 = vector.multi_reduction <add>, %78, %cst_36 [0] : vector<8x1xf32> to vector<1xf32>
    %80 = vector.shape_cast %79 : vector<1xf32> to vector<1x1xf32>
    %81 = arith.addf %68, %80 : vector<1x1xf32>
    %cst_37 = arith.constant 1.250000e-01 : f32
    %82 = vector.broadcast %cst_37 : f32 to vector<1x1xf32>
    %83 = arith.mulf %81, %82 : vector<1x1xf32>
    %c0_38 = arith.constant 0 : index
    %c0_39 = arith.constant 0 : index
    %84 = vector.load %arg9[%c0_38, %c0_39] : memref<128x256xbf16, #tpu.memory_space<vmem>>, vector<128x256xbf16>
    %c0_40 = arith.constant 0 : index
    %c0_41 = arith.constant 0 : index
    %85 = vector.load %arg10[%c0_40, %c0_41] : memref<1x256xf32, #tpu.memory_space<vmem>>, vector<1x256xf32>
    %c0_42 = arith.constant 0 : index
    %c0_43 = arith.constant 0 : index
    %86 = vector.load %arg11[%c0_42, %c0_43] : memref<256x256xbf16, #tpu.memory_space<vmem>>, vector<256x256xbf16>
    %c0_44 = arith.constant 0 : index
    %c0_45 = arith.constant 0 : index
    %87 = vector.load %arg12[%c0_44, %c0_45] : memref<1x256xf32, #tpu.memory_space<vmem>>, vector<1x256xf32>
    %c0_46 = arith.constant 0 : index
    %c0_47 = arith.constant 0 : index
    %88 = vector.load %arg13[%c0_46, %c0_47] : memref<256x128xbf16, #tpu.memory_space<vmem>>, vector<256x128xbf16>
    %c0_48 = arith.constant 0 : index
    %c0_49 = arith.constant 0 : index
    %89 = vector.load %arg14[%c0_48, %c0_49] : memref<1x128xf32, #tpu.memory_space<vmem>>, vector<1x128xf32>
    %c0_50 = arith.constant 0 : index
    %c0_51 = arith.constant 0 : index
    %90 = vector.load %arg15[%c0_50, %c0_51] : memref<256x128xbf16, #tpu.memory_space<vmem>>, vector<256x128xbf16>
    %c0_52 = arith.constant 0 : index
    %c0_53 = arith.constant 0 : index
    %91 = vector.load %arg16[%c0_52, %c0_53] : memref<1x128xf32, #tpu.memory_space<vmem>>, vector<1x128xf32>
    %cst_54 = arith.constant dense<0.000000e+00> : vector<128xf32>
    %92 = vector.multi_reduction <add>, %0, %cst_54 [0] : vector<8x128xf32> to vector<128xf32>
    %93 = vector.shape_cast %92 : vector<128xf32> to vector<1x128xf32>
    %cst_55 = arith.constant 1.250000e-01 : f32
    %94 = vector.broadcast %cst_55 : f32 to vector<1x128xf32>
    %95 = arith.mulf %93, %94 : vector<1x128xf32>
    %96 = arith.truncf %0 : vector<8x128xf32> to vector<8x128xbf16>
    %cst_56 = arith.constant dense<0.000000e+00> : vector<8x256xf32>
    %97 = tpu.matmul %96, %84, %cst_56 {dimension_numbers = #tpu.dot_dimension_numbers<[1], [0], [0], [1], [0, 0, 1, 1], [], []>} : vector<8x128xbf16>, vector<128x256xbf16>, vector<8x256xf32> -> vector<8x256xf32>
    %98 = vector.broadcast %85 : vector<1x256xf32> to vector<8x256xf32>
    %99 = arith.addf %97, %98 : vector<8x256xf32>
    %cst_57 = arith.constant 0.000000e+00 : f32
    %100 = vector.broadcast %cst_57 : f32 to vector<8x256xf32>
    %101 = arith.maximumf %99, %100 : vector<8x256xf32>
    %102 = arith.truncf %101 : vector<8x256xf32> to vector<8x256xbf16>
    %cst_58 = arith.constant dense<0.000000e+00> : vector<8x256xf32>
    %103 = tpu.matmul %102, %86, %cst_58 {dimension_numbers = #tpu.dot_dimension_numbers<[1], [0], [0], [1], [0, 0, 1, 1], [], []>} : vector<8x256xbf16>, vector<256x256xbf16>, vector<8x256xf32> -> vector<8x256xf32>
    %104 = vector.broadcast %87 : vector<1x256xf32> to vector<8x256xf32>
    %105 = arith.addf %103, %104 : vector<8x256xf32>
    %cst_59 = arith.constant 0.000000e+00 : f32
    %106 = vector.broadcast %cst_59 : f32 to vector<8x256xf32>
    %107 = arith.maximumf %105, %106 : vector<8x256xf32>
    %108 = arith.truncf %107 : vector<8x256xf32> to vector<8x256xbf16>
    %cst_60 = arith.constant dense<0.000000e+00> : vector<8x128xf32>
    %109 = tpu.matmul %108, %88, %cst_60 {dimension_numbers = #tpu.dot_dimension_numbers<[1], [0], [0], [1], [0, 0, 1, 1], [], []>} : vector<8x256xbf16>, vector<256x128xbf16>, vector<8x128xf32> -> vector<8x128xf32>
    %110 = vector.broadcast %89 : vector<1x128xf32> to vector<8x128xf32>
    %111 = arith.addf %109, %110 : vector<8x128xf32>
    %112 = math.tanh %111 : vector<8x128xf32>
    %113 = arith.truncf %107 : vector<8x256xf32> to vector<8x256xbf16>
    %cst_61 = arith.constant dense<0.000000e+00> : vector<8x128xf32>
    %114 = tpu.matmul %113, %90, %cst_61 {dimension_numbers = #tpu.dot_dimension_numbers<[1], [0], [0], [1], [0, 0, 1, 1], [], []>} : vector<8x256xbf16>, vector<256x128xbf16>, vector<8x128xf32> -> vector<8x128xf32>
    %115 = vector.broadcast %91 : vector<1x128xf32> to vector<8x128xf32>
    %116 = arith.addf %114, %115 : vector<8x128xf32>
    %117 = math.tanh %116 : vector<8x128xf32>
    %cst_62 = arith.constant 0.000000e+00 : f32
    %118 = vector.broadcast %cst_62 : f32 to vector<8x128xf32>
    %119 = arith.subf %118, %117 : vector<8x128xf32>
    %120 = math.exp %119 : vector<8x128xf32>
    %121 = vector.broadcast %95 : vector<1x128xf32> to vector<8x128xf32>
    %122 = arith.subf %112, %121 : vector<8x128xf32>
    %123 = vector.broadcast %95 : vector<1x128xf32> to vector<8x128xf32>
    %124 = arith.subf %112, %123 : vector<8x128xf32>
    %125 = arith.mulf %122, %124 : vector<8x128xf32>
    %126 = arith.mulf %125, %120 : vector<8x128xf32>
    %127 = arith.addf %126, %117 : vector<8x128xf32>
    %cst_63 = arith.constant dense<0.000000e+00> : vector<8xf32>
    %128 = vector.multi_reduction <add>, %127, %cst_63 [1] : vector<8x128xf32> to vector<8xf32>
    %129 = vector.shape_cast %128 : vector<8xf32> to vector<8x1xf32>
    %cst_64 = arith.constant dense<0.000000e+00> : vector<1xf32>
    %130 = vector.multi_reduction <add>, %129, %cst_64 [0] : vector<8x1xf32> to vector<1xf32>
    %131 = vector.shape_cast %130 : vector<1xf32> to vector<1x1xf32>
    %cst_65 = arith.constant 1.250000e-01 : f32
    %132 = vector.broadcast %cst_65 : f32 to vector<1x1xf32>
    %133 = arith.mulf %131, %132 : vector<1x1xf32>
    %cst_66 = arith.constant 0.000000e+00 : f32
    %134 = vector.broadcast %cst_66 : f32 to vector<1x1xf32>
    %c0_67 = arith.constant 0 : index
    %c0_68 = arith.constant 0 : index
    %135 = vector.load %arg17[%c0_67, %c0_68] : memref<128x256xbf16, #tpu.memory_space<vmem>>, vector<128x256xbf16>
    %c0_69 = arith.constant 0 : index
    %c0_70 = arith.constant 0 : index
    %136 = vector.load %arg18[%c0_69, %c0_70] : memref<1x256xf32, #tpu.memory_space<vmem>>, vector<1x256xf32>
    %c0_71 = arith.constant 0 : index
    %c0_72 = arith.constant 0 : index
    %137 = vector.load %arg19[%c0_71, %c0_72] : memref<256x256xbf16, #tpu.memory_space<vmem>>, vector<256x256xbf16>
    %c0_73 = arith.constant 0 : index
    %c0_74 = arith.constant 0 : index
    %138 = vector.load %arg20[%c0_73, %c0_74] : memref<1x256xf32, #tpu.memory_space<vmem>>, vector<1x256xf32>
    %c0_75 = arith.constant 0 : index
    %c0_76 = arith.constant 0 : index
    %139 = vector.load %arg21[%c0_75, %c0_76] : memref<256x128xbf16, #tpu.memory_space<vmem>>, vector<256x128xbf16>
    %c0_77 = arith.constant 0 : index
    %c0_78 = arith.constant 0 : index
    %140 = vector.load %arg22[%c0_77, %c0_78] : memref<1x128xf32, #tpu.memory_space<vmem>>, vector<1x128xf32>
    %c0_79 = arith.constant 0 : index
    %c0_80 = arith.constant 0 : index
    %141 = vector.load %arg23[%c0_79, %c0_80] : memref<256x128xbf16, #tpu.memory_space<vmem>>, vector<256x128xbf16>
    %c0_81 = arith.constant 0 : index
    %c0_82 = arith.constant 0 : index
    %142 = vector.load %arg24[%c0_81, %c0_82] : memref<1x128xf32, #tpu.memory_space<vmem>>, vector<1x128xf32>
    %cst_83 = arith.constant dense<0.000000e+00> : vector<128xf32>
    %143 = vector.multi_reduction <add>, %1, %cst_83 [0] : vector<8x128xf32> to vector<128xf32>
    %144 = vector.shape_cast %143 : vector<128xf32> to vector<1x128xf32>
    %cst_84 = arith.constant 1.250000e-01 : f32
    %145 = vector.broadcast %cst_84 : f32 to vector<1x128xf32>
    %146 = arith.mulf %144, %145 : vector<1x128xf32>
    %147 = arith.truncf %1 : vector<8x128xf32> to vector<8x128xbf16>
    %cst_85 = arith.constant dense<0.000000e+00> : vector<8x256xf32>
    %148 = tpu.matmul %147, %135, %cst_85 {dimension_numbers = #tpu.dot_dimension_numbers<[1], [0], [0], [1], [0, 0, 1, 1], [], []>} : vector<8x128xbf16>, vector<128x256xbf16>, vector<8x256xf32> -> vector<8x256xf32>
    %149 = vector.broadcast %136 : vector<1x256xf32> to vector<8x256xf32>
    %150 = arith.addf %148, %149 : vector<8x256xf32>
    %cst_86 = arith.constant 0.000000e+00 : f32
    %151 = vector.broadcast %cst_86 : f32 to vector<8x256xf32>
    %152 = arith.maximumf %150, %151 : vector<8x256xf32>
    %153 = arith.truncf %152 : vector<8x256xf32> to vector<8x256xbf16>
    %cst_87 = arith.constant dense<0.000000e+00> : vector<8x256xf32>
    %154 = tpu.matmul %153, %137, %cst_87 {dimension_numbers = #tpu.dot_dimension_numbers<[1], [0], [0], [1], [0, 0, 1, 1], [], []>} : vector<8x256xbf16>, vector<256x256xbf16>, vector<8x256xf32> -> vector<8x256xf32>
    %155 = vector.broadcast %138 : vector<1x256xf32> to vector<8x256xf32>
    %156 = arith.addf %154, %155 : vector<8x256xf32>
    %cst_88 = arith.constant 0.000000e+00 : f32
    %157 = vector.broadcast %cst_88 : f32 to vector<8x256xf32>
    %158 = arith.maximumf %156, %157 : vector<8x256xf32>
    %159 = arith.truncf %158 : vector<8x256xf32> to vector<8x256xbf16>
    %cst_89 = arith.constant dense<0.000000e+00> : vector<8x128xf32>
    %160 = tpu.matmul %159, %139, %cst_89 {dimension_numbers = #tpu.dot_dimension_numbers<[1], [0], [0], [1], [0, 0, 1, 1], [], []>} : vector<8x256xbf16>, vector<256x128xbf16>, vector<8x128xf32> -> vector<8x128xf32>
    %161 = vector.broadcast %140 : vector<1x128xf32> to vector<8x128xf32>
    %162 = arith.addf %160, %161 : vector<8x128xf32>
    %163 = math.tanh %162 : vector<8x128xf32>
    %164 = arith.truncf %158 : vector<8x256xf32> to vector<8x256xbf16>
    %cst_90 = arith.constant dense<0.000000e+00> : vector<8x128xf32>
    %165 = tpu.matmul %164, %141, %cst_90 {dimension_numbers = #tpu.dot_dimension_numbers<[1], [0], [0], [1], [0, 0, 1, 1], [], []>} : vector<8x256xbf16>, vector<256x128xbf16>, vector<8x128xf32> -> vector<8x128xf32>
    %166 = vector.broadcast %142 : vector<1x128xf32> to vector<8x128xf32>
    %167 = arith.addf %165, %166 : vector<8x128xf32>
    %168 = math.tanh %167 : vector<8x128xf32>
    %cst_91 = arith.constant 0.000000e+00 : f32
    %169 = vector.broadcast %cst_91 : f32 to vector<8x128xf32>
    %170 = arith.subf %169, %168 : vector<8x128xf32>
    %171 = math.exp %170 : vector<8x128xf32>
    %172 = vector.broadcast %146 : vector<1x128xf32> to vector<8x128xf32>
    %173 = arith.subf %163, %172 : vector<8x128xf32>
    %174 = vector.broadcast %146 : vector<1x128xf32> to vector<8x128xf32>
    %175 = arith.subf %163, %174 : vector<8x128xf32>
    %176 = arith.mulf %173, %175 : vector<8x128xf32>
    %177 = arith.mulf %176, %171 : vector<8x128xf32>
    %178 = arith.addf %177, %168 : vector<8x128xf32>
    %cst_92 = arith.constant dense<0.000000e+00> : vector<8xf32>
    %179 = vector.multi_reduction <add>, %178, %cst_92 [1] : vector<8x128xf32> to vector<8xf32>
    %180 = vector.shape_cast %179 : vector<8xf32> to vector<8x1xf32>
    %cst_93 = arith.constant dense<0.000000e+00> : vector<1xf32>
    %181 = vector.multi_reduction <add>, %180, %cst_93 [0] : vector<8x1xf32> to vector<1xf32>
    %182 = vector.shape_cast %181 : vector<1xf32> to vector<1x1xf32>
    %cst_94 = arith.constant 1.250000e-01 : f32
    %183 = vector.broadcast %cst_94 : f32 to vector<1x1xf32>
    %184 = arith.mulf %182, %183 : vector<1x1xf32>
    %cst_95 = arith.constant 0.000000e+00 : f32
    %185 = vector.broadcast %cst_95 : f32 to vector<1x1xf32>
    %186 = tpu.iota {dimensions = array<i32: 1>} : vector<1x128xi32>
    %c0_i32 = arith.constant 0 : i32
    %187 = vector.broadcast %c0_i32 : i32 to vector<1x128xi32>
    %188 = arith.cmpi eq, %186, %187 : vector<1x128xi32>
    %c1_i32_96 = arith.constant 1 : i32
    %189 = vector.broadcast %c1_i32_96 : i32 to vector<1x128xi32>
    %190 = arith.cmpi eq, %186, %189 : vector<1x128xi32>
    %c2_i32 = arith.constant 2 : i32
    %191 = vector.broadcast %c2_i32 : i32 to vector<1x128xi32>
    %192 = arith.cmpi eq, %186, %191 : vector<1x128xi32>
    %c3_i32 = arith.constant 3 : i32
    %193 = vector.broadcast %c3_i32 : i32 to vector<1x128xi32>
    %194 = arith.cmpi eq, %186, %193 : vector<1x128xi32>
    %c4_i32 = arith.constant 4 : i32
    %195 = vector.broadcast %c4_i32 : i32 to vector<1x128xi32>
    %196 = arith.cmpi eq, %186, %195 : vector<1x128xi32>
    %c5_i32 = arith.constant 5 : i32
    %197 = vector.broadcast %c5_i32 : i32 to vector<1x128xi32>
    %198 = arith.cmpi eq, %186, %197 : vector<1x128xi32>
    %cst_97 = arith.constant 0.000000e+00 : f32
    %199 = vector.shape_cast %184 : vector<1x1xf32> to vector<1x1xf32>
    %200 = vector.broadcast %199 : vector<1x1xf32> to vector<1x128xf32>
    %201 = vector.broadcast %cst_97 : f32 to vector<1x128xf32>
    %202 = arith.select %198, %200, %201 : vector<1x128xi1>, vector<1x128xf32>
    %203 = vector.shape_cast %133 : vector<1x1xf32> to vector<1x1xf32>
    %204 = vector.broadcast %203 : vector<1x1xf32> to vector<1x128xf32>
    %205 = arith.select %196, %204, %202 : vector<1x128xi1>, vector<1x128xf32>
    %206 = vector.shape_cast %83 : vector<1x1xf32> to vector<1x1xf32>
    %207 = vector.broadcast %206 : vector<1x1xf32> to vector<1x128xf32>
    %208 = arith.select %194, %207, %205 : vector<1x128xi1>, vector<1x128xf32>
    %209 = vector.shape_cast %185 : vector<1x1xf32> to vector<1x1xf32>
    %210 = vector.broadcast %209 : vector<1x1xf32> to vector<1x128xf32>
    %211 = arith.select %192, %210, %208 : vector<1x128xi1>, vector<1x128xf32>
    %212 = vector.shape_cast %134 : vector<1x1xf32> to vector<1x1xf32>
    %213 = vector.broadcast %212 : vector<1x1xf32> to vector<1x128xf32>
    %214 = arith.select %190, %213, %211 : vector<1x128xi1>, vector<1x128xf32>
    %215 = vector.shape_cast %54 : vector<1x1xf32> to vector<1x1xf32>
    %216 = vector.broadcast %215 : vector<1x1xf32> to vector<1x128xf32>
    %217 = arith.select %188, %216, %214 : vector<1x128xi1>, vector<1x128xf32>
    %c0_98 = arith.constant 0 : index
    %c0_99 = arith.constant 0 : index
    %218 = vector.load %arg25[%c0_98, %c0_99] : memref<1x128xf32, #tpu.memory_space<vmem>>, vector<1x128xf32>
    tpu.vector_store %arg25[%c0_98, %c0_99], %217 {strides = array<i32>} : memref<1x128xf32, #tpu.memory_space<vmem>>, vector<1x128xf32>,
    return
  }
}

</mosaic_0001>

<bundles_post_ra>
// kernel: tpu_custom_call.1
= control target key start
LH: loop header
LB: loop body
LE: loop exit
PB: predicated region body
PF: predicated region fallthrough
CT: control target
= control target key end

     0   :  { %s3825_s0 = inlined_call_operand.hbm [shape: f32[8,128], index: 0, kind: input, shape index: {}]   ;;  %s3826_s1 = inlined_call_operand.hbm [shape: f32[8,128], index: 1, kind: input, shape index: {}]   ;;  %s3827_s2 = inlined_call_operand.hbm [shape: bf16[128,256], index: 2, kind: input, shape index: {}]   ;;  %s3828_s3 = inlined_call_operand.hbm [shape: bf16[128,256], index: 3, kind: input, shape index: {}]   ;;  %s3829_s4 = inlined_call_operand.vmem [shape: f32[1,256], index: 4, kind: input, shape index: {}]   ;;  %s3830_s5 = inlined_call_operand.hbm [shape: bf16[256,256], index: 5, kind: input, shape index: {}]   ;;  %s3831_s6 = inlined_call_operand.vmem [shape: f32[1,256], index: 6, kind: input, shape index: {}]   ;;  %s3832_s7 = inlined_call_operand.vmem [shape: bf16[1,256], index: 7, kind: input, shape index: {}]   ;;  %s3833_s8 = inlined_call_operand.<no memory space> [shape: f32[1,1], index: 8, kind: input, shape index: {}]   ;;  %s3834_s9 = inlined_call_operand.hbm [shape: bf16[128,256], index: 9, kind: input, shape index: {}]   ;;  %s3835_s10 = inlined_call_operand.vmem [shape: f32[1,256], index: 10, kind: input, shape index: {}]   ;;  %s3836_s11 = inlined_call_operand.hbm [shape: bf16[256,256], index: 11, kind: input, shape index: {}]   ;;  %s3837_s12 = inlined_call_operand.vmem [shape: f32[1,256], index: 12, kind: input, shape index: {}]   ;;  %s3838_s13 = inlined_call_operand.hbm [shape: bf16[256,128], index: 13, kind: input, shape index: {}]   ;;  %s3839_s14 = inlined_call_operand.vmem [shape: f32[1,128], index: 14, kind: input, shape index: {}]   ;;  %s3840_s15 = inlined_call_operand.hbm [shape: bf16[256,128], index: 15, kind: input, shape index: {}]   ;;  %s3841_s16 = inlined_call_operand.vmem [shape: f32[1,128], index: 16, kind: input, shape index: {}]   ;;  %s3842_s17 = inlined_call_operand.hbm [shape: bf16[128,256], index: 17, kind: input, shape index: {}]   ;;  %s3843_s18 = inlined_call_operand.vmem [shape: f32[1,256], index: 18, kind: input, shape index: {}]   ;;  %s3844_s19 = inlined_call_operand.hbm [shape: bf16[256,256], index: 19, kind: input, shape index: {}]   ;;  %s3845_s20 = inlined_call_operand.vmem [shape: f32[1,256], index: 20, kind: input, shape index: {}]   ;;  %s3846_s21 = inlined_call_operand.hbm [shape: bf16[256,128], index: 21, kind: input, shape index: {}]   ;;  %s3847_s22 = inlined_call_operand.vmem [shape: f32[1,128], index: 22, kind: input, shape index: {}]   ;;  %s3848_s23 = inlined_call_operand.hbm [shape: bf16[256,128], index: 23, kind: input, shape index: {}]   ;;  %s3849_s24 = inlined_call_operand.vmem [shape: f32[1,128], index: 24, kind: input, shape index: {}]   ;;  %s3850_s25 = inlined_call_operand.hbm [shape: f32[1,128], index: 25, kind: output, shape index: {}]  }
   0x1   :  { %3851 = sst [smem:[#allocation33_spill]] %s3825_s0 }
   0x2   :  { %3852 = sst [smem:[#allocation34_spill]] %s3826_s1 }
   0x3   :  { %3853 = sst [smem:[#allocation35_spill]] %s3827_s2 }
   0x4   :  { %3854 = sst [smem:[#allocation36_spill]] %s3828_s3 }
   0x5   :  { %3855 = sst [smem:[#allocation37_spill]] %s3829_s4 }
   0x6   :  { %3856 = sst [smem:[#allocation38_spill]] %s3830_s5 }
   0x7   :  { %3857 = sst [smem:[#allocation39_spill]] %s3831_s6 }
   0x8   :  { %3858 = sst [smem:[#allocation40_spill]] %s3832_s7 }
   0x9   :  { %3859 = sst [smem:[#allocation41_spill]] %s3833_s8 }
   0xa   :  { %3860 = sst [smem:[#allocation42_spill]] %s3834_s9 }
   0xb   :  { %s3861_s6 = sld [smem:[#allocation41_spill]] }
  0x11   :  { %v30_v0 = vstv %s3861_s6 }
  0x12   :  { %31 = vst [vmem:[#allocation2] sm:$0x1] %v30_v0 }
  0x13   :  { %32 = vsyncpa [#allocation4], 0 }
  0x14   :  { %33 = vsyncpa [#allocation7], 0 }
  0x15   :  { %34 = vsyncpa [#allocation10], 0 }
  0x16   :  { %35 = vsyncpa [#allocation13], 0 }
  0x17   :  { %36 = vsyncpa [#allocation16], 0 }
  0x18   :  { %37 = vsyncpa [#allocation19], 0 }
  0x19   :  { %38 = vsyncpa [#allocation22], 0 }
  0x1a   :  { %39 = vsyncpa [#allocation5], 0  ;;  %s3498_s30 = smov [#allocation6]  }
  0x1b   :  { %s56_s7 = sshll.u32 %s3498_s30, 4  ;;  %s57_s7 = int_to_ptr.vmem [resolvable:$true] %s56_s7 }
  0x1c   :  { %s3210_s3 = scalar_lea.vmem %s57_s7, 128  ;;  %p3215_p1 = scmp.lt.s32.totalorder %s57_s7, %s57_s7 }
  0x1d   :  { %p3211_p0 = scmp.ne.s32.totalorder %s57_s7, %s3210_s3  ;;  %p3216_p2 = scmp.lt.s32.totalorder %s3210_s3, %s3210_s3 }
  0x1f   :  { %p3217_p3 = por %p3216_p2, %p3215_p1 }
  0x21   :  { %p3218_p4 = pnand %p3217_p3, %p3211_p0 }
  0x23   :  { %3221 = shalt.err (!%p3218_p4)
}
  0x24   :  { %s3862_s8 = sld [smem:[#allocation34_spill]]  ;;  %s3499_s27 = smov [#allocation9]  }
  0x25   :  { %s77_s4 = sshll.u32 %s3499_s27, 4  ;;  %s3500_s28 = smov [#allocation12]   ;;  %s78_s4 = int_to_ptr.vmem [resolvable:$true] %s77_s4 }
  0x26   :  { %s109_s9 = sshll.u32 %s3500_s28, 4  ;;  %s3230_s5 = scalar_lea.vmem %s78_s4, 2048  ;;  %s110_s9 = int_to_ptr.vmem [resolvable:$true] %s109_s9 }
  0x27   :  { %p3231_p5 = scmp.ne.s32.totalorder %s78_s4, %s3230_s5  ;;  %p3235_p6 = scmp.lt.s32.totalorder %s78_s4, %s78_s4 }
  0x28   :  { %p3236_p7 = scmp.lt.s32.totalorder %s3230_s5, %s3230_s5 }
  0x2a   :  { %59 = dma.hbm_to_vmem [thread:$0]  %s3862_s8, 128, %s57_s7, [#allocation7]  }
  0x2b   :  { %p3237_p8 = por %p3236_p7, %p3235_p6 }
  0x2d   :  { %p3238_p9 = pnand %p3237_p8, %p3231_p5 }
  0x2f   :  { %3241 = shalt.err (!%p3238_p9)
}
  0x30   :  { %s3501_s0 = smov 128   ;;  %s3502_s29 = smov 8  }
  0x31   :  { %s3863_s30 = sld [smem:[#allocation36_spill]]  ;;  %s3250_s7 = scalar_lea.vmem %s110_s9, 2048 }
  0x32   :  { %p3251_p10 = scmp.ne.s32.totalorder %s110_s9, %s3250_s7  ;;  %p3255_p11 = scmp.lt.s32.totalorder %s110_s9, %s110_s9 }
  0x33   :  { %p3256_p12 = scmp.lt.s32.totalorder %s3250_s7, %s3250_s7 }
  0x35   :  { %p3257_p13 = por %p3256_p12, %p3255_p11 }
  0x37   :  { %83 = dma.hbm_to_vmem [thread:$0]  %s3863_s30, 2048, %s78_s4, [#allocation10], %s3501_s0, %s3501_s0, %s3502_s29  }
  0x38   :  { %p3258_p0 = pnand %p3257_p13, %p3251_p10 }
  0x3a   :  { %3261 = shalt.err (!%p3258_p0)
}
  0x3b   :  { %s3864_s1 = sld [smem:[#allocation42_spill]]  ;;  %s3503_s8 = smov [#allocation15]  }
  0x3c   :  { %s137_s27 = sshll.u32 %s3503_s8, 4  ;;  %s138_s27 = int_to_ptr.vmem [resolvable:$true] %s137_s27 }
  0x3d   :  { %s3270_s28 = scalar_lea.vmem %s138_s27, 2048  ;;  %p3275_p2 = scmp.lt.s32.totalorder %s138_s27, %s138_s27 }
  0x3e   :  { %p3271_p1 = scmp.ne.s32.totalorder %s138_s27, %s3270_s28  ;;  %p3276_p3 = scmp.lt.s32.totalorder %s3270_s28, %s3270_s28 }
  0x40   :  { %p3277_p4 = por %p3276_p3, %p3275_p2 }
  0x41   :  { %115 = dma.hbm_to_vmem [thread:$0]  %s3864_s1, 2048, %s110_s9, [#allocation13], %s3501_s0, %s3501_s0, %s3502_s29  }
  0x42   :  { %p3278_p5 = pnand %p3277_p4, %p3271_p1 }
  0x44   :  { %3281 = shalt.err (!%p3278_p5)
}
  0x45   :  { %s3504_s4 = smov 64   ;;  %s3505_s5 = smov 4  }
  0x46   :  { %143 = dma.hbm_to_vmem [thread:$0]  %s3838_s13, 2048, %s138_s27, [#allocation16], %s3504_s4, %s3504_s4, %s3505_s5  }
  0x47   :  { %s3506_s9 = smov [#allocation18]   ;;  %s3507_s7 = smov [#allocation21]  }
  0x48   :  { %s165_s30 = sshll.u32 %s3506_s9, 4  ;;  %s193_s3 = sshll.u32 %s3507_s7, 4  ;;  %s166_s30 = int_to_ptr.vmem [resolvable:$true] %s165_s30  ;;  %s194_s3 = int_to_ptr.vmem [resolvable:$true] %s193_s3 }
  0x49   :  { %s3290_s26 = scalar_lea.vmem %s166_s30, 2048  ;;  %p3295_p7 = scmp.lt.s32.totalorder %s166_s30, %s166_s30 }
  0x4a   :  { %p3291_p6 = scmp.ne.s32.totalorder %s166_s30, %s3290_s26  ;;  %p3296_p8 = scmp.lt.s32.totalorder %s3290_s26, %s3290_s26 }
  0x4c   :  { %p3297_p9 = por %p3296_p8, %p3295_p7 }
  0x4e   :  { %p3298_p10 = pnand %p3297_p9, %p3291_p6 }
  0x50   :  { %3301 = shalt.err (!%p3298_p10)
}
  0x51   :  { %171 = dma.hbm_to_vmem [thread:$0]  %s3842_s17, 2048, %s166_s30, [#allocation19], %s3501_s0, %s3501_s0, %s3502_s29  }
  0x52   :  { %s3310_s13 = scalar_lea.vmem %s194_s3, 2048  ;;  %p3315_p12 = scmp.lt.s32.totalorder %s194_s3, %s194_s3 }
  0x53   :  { %p3311_p11 = scmp.ne.s32.totalorder %s194_s3, %s3310_s13  ;;  %p3316_p13 = scmp.lt.s32.totalorder %s3310_s13, %s3310_s13 }
  0x55   :  { %p3317_p0 = por %p3316_p13, %p3315_p12 }
  0x57   :  { %p3318_p1 = pnand %p3317_p0, %p3311_p11 }
  0x59   :  { %3321 = shalt.err (!%p3318_p1)
}
  0x5a   :  { %199 = dma.hbm_to_vmem [thread:$0]  %s3846_s21, 2048, %s194_s3, [#allocation22], %s3504_s4, %s3504_s4, %s3505_s5  }
  0x5b   :  { %s3508_s2 = smov [#allocation3]   ;;  %s3509_s9 = smov [#allocation8]  }
  0x5c   :  { %s46_s6 = sshll.u32 %s3508_s2, 4  ;;  %s65_s7 = sshll.u32 %s3509_s9, 4  ;;  %s47_s6 = int_to_ptr.vmem [resolvable:$true] %s46_s6  ;;  %s66_s7 = int_to_ptr.vmem [resolvable:$true] %s65_s7 }
  0x5d   :  { %s3330_s17 = scalar_lea.vmem %s47_s6, 128  ;;  %p3335_p3 = scmp.lt.s32.totalorder %s47_s6, %s47_s6 }
  0x5e   :  { %p3331_p2 = scmp.ne.s32.totalorder %s47_s6, %s3330_s17  ;;  %p3336_p4 = scmp.lt.s32.totalorder %s3330_s17, %s3330_s17 }
  0x60   :  { %p3337_p5 = por %p3336_p4, %p3335_p3 }
  0x62   :  { %p3338_p6 = pnand %p3337_p5, %p3331_p2 }
  0x64   :  { %3341 = shalt.err (!%p3338_p6)
}
  0x65   :  { %s3865_s1 = sld [smem:[#allocation33_spill]]  ;;  %s3350_s8 = scalar_lea.vmem %s66_s7, 2048 }
  0x66   :  { %p3351_p7 = scmp.ne.s32.totalorder %s66_s7, %s3350_s8  ;;  %p3355_p8 = scmp.lt.s32.totalorder %s66_s7, %s66_s7 }
  0x67   :  { %p3356_p9 = scmp.lt.s32.totalorder %s3350_s8, %s3350_s8 }
  0x69   :  { %p3357_p10 = por %p3356_p9, %p3355_p8 }
  0x6b   :  { %49 = dma.hbm_to_vmem [thread:$0]  %s3865_s1, 128, %s47_s6, [#allocation4]  }
  0x6c   :  { %p3358_p11 = pnand %p3357_p10, %p3351_p7 }
  0x6e   :  { %3361 = shalt.err (!%p3358_p11)
}
  0x6f   :  { %s3866_s13 = sld [smem:[#allocation35_spill]]  ;;  %s3510_s27 = smov [#allocation11]  }
  0x70   :  { %s91_s28 = sshll.u32 %s3510_s27, 4  ;;  %s3511_s2 = smov [#allocation14]   ;;  %s92_s28 = int_to_ptr.vmem [resolvable:$true] %s91_s28 }
  0x71   :  { %s123_s9 = sshll.u32 %s3511_s2, 4  ;;  %s3370_s6 = scalar_lea.vmem %s92_s28, 4096  ;;  %s124_s9 = int_to_ptr.vmem [resolvable:$true] %s123_s9 }
  0x72   :  { %p3371_p12 = scmp.ne.s32.totalorder %s92_s28, %s3370_s6  ;;  %p3375_p13 = scmp.lt.s32.totalorder %s92_s28, %s92_s28 }
  0x73   :  { %p3376_p0 = scmp.lt.s32.totalorder %s3370_s6, %s3370_s6 }
  0x75   :  { %71 = dma.hbm_to_vmem [thread:$0]  %s3866_s13, 2048, %s66_s7, [#allocation7], %s3501_s0, %s3501_s0, %s3502_s29  }
  0x76   :  { %p3377_p1 = por %p3376_p0, %p3375_p13 }
  0x78   :  { %p3378_p2 = pnand %p3377_p1, %p3371_p12 }
  0x7a   :  { %3381 = shalt.err (!%p3378_p2)
}
  0x7b   :  { %s3867_s26 = sld [smem:[#allocation38_spill]]  ;;  %s3390_s7 = scalar_lea.vmem %s124_s9, 4096 }
  0x7c   :  { %p3391_p3 = scmp.ne.s32.totalorder %s124_s9, %s3390_s7  ;;  %p3395_p4 = scmp.lt.s32.totalorder %s124_s9, %s124_s9 }
  0x7d   :  { %p3396_p5 = scmp.lt.s32.totalorder %s3390_s7, %s3390_s7 }
  0x7f   :  { %p3397_p6 = por %p3396_p5, %p3395_p4 }
  0x81   :  { %97 = dma.hbm_to_vmem [thread:$0]  %s3867_s26, 4096, %s92_s28, [#allocation10], %s3501_s0, %s3501_s0, %s3502_s29  }
  0x82   :  { %p3398_p7 = pnand %p3397_p6, %p3391_p3 }
  0x84   :  { %3401 = shalt.err (!%p3398_p7)
}
  0x85   :  { %129 = dma.hbm_to_vmem [thread:$0]  %s3836_s11, 4096, %s124_s9, [#allocation13], %s3501_s0, %s3501_s0, %s3502_s29  }
  0x86   :  { %s3512_s21 = smov [#allocation17]   ;;  %s3513_s13 = smov [#allocation20]  }
  0x87   :  { %s151_s3 = sshll.u32 %s3512_s21, 4  ;;  %s179_s27 = sshll.u32 %s3513_s13, 4  ;;  %s152_s3 = int_to_ptr.vmem [resolvable:$true] %s151_s3  ;;  %s180_s27 = int_to_ptr.vmem [resolvable:$true] %s179_s27 }
  0x88   :  { %s3410_s28 = scalar_lea.vmem %s152_s3, 2048  ;;  %p3415_p9 = scmp.lt.s32.totalorder %s152_s3, %s152_s3 }
  0x89   :  { %p3411_p8 = scmp.ne.s32.totalorder %s152_s3, %s3410_s28  ;;  %p3416_p10 = scmp.lt.s32.totalorder %s3410_s28, %s3410_s28 }
  0x8b   :  { %p3417_p11 = por %p3416_p10, %p3415_p9 }
  0x8d   :  { %p3418_p12 = pnand %p3417_p11, %p3411_p8 }
  0x8f   :  { %3421 = shalt.err (!%p3418_p12)
}
  0x90   :  { %157 = dma.hbm_to_vmem [thread:$0]  %s3840_s15, 2048, %s152_s3, [#allocation16], %s3504_s4, %s3504_s4, %s3505_s5  }
  0x91   :  { %s3430_s11 = scalar_lea.vmem %s180_s27, 4096  ;;  %p3435_p0 = scmp.lt.s32.totalorder %s180_s27, %s180_s27 }
  0x92   :  { %p3431_p13 = scmp.ne.s32.totalorder %s180_s27, %s3430_s11  ;;  %p3436_p1 = scmp.lt.s32.totalorder %s3430_s11, %s3430_s11 }
  0x94   :  { %p3437_p2 = por %p3436_p1, %p3435_p0 }
  0x96   :  { %p3438_p3 = pnand %p3437_p2, %p3431_p13 }
  0x98   :  { %3441 = shalt.err (!%p3438_p3)
}
  0x99   :  { %185 = dma.hbm_to_vmem [thread:$0]  %s3844_s19, 4096, %s180_s27, [#allocation19], %s3501_s0, %s3501_s0, %s3502_s29  }
  0x9a   :  { %s3514_s30 = smov [#allocation23]  }
  0x9b   :  { %s207_s26 = sshll.u32 %s3514_s30, 4  ;;  %s208_s26 = int_to_ptr.vmem [resolvable:$true] %s207_s26 }
  0x9c   :  { %s3450_s7 = scalar_lea.vmem %s208_s26, 2048  ;;  %p3455_p5 = scmp.lt.s32.totalorder %s208_s26, %s208_s26 }
  0x9d   :  { %p3451_p4 = scmp.ne.s32.totalorder %s208_s26, %s3450_s7  ;;  %p3456_p6 = scmp.lt.s32.totalorder %s3450_s7, %s3450_s7 }
  0x9f   :  { %p3457_p7 = por %p3456_p6, %p3455_p5 }
  0xa1   :  { %p3458_p8 = pnand %p3457_p7, %p3451_p4 }
  0xa3   :  { %3461 = shalt.err (!%p3458_p8)
}
  0xa4   :  { %213 = dma.hbm_to_vmem [thread:$0]  %s3848_s23, 2048, %s208_s26, [#allocation22], %s3504_s4, %s3504_s4, %s3505_s5  }
  0xa5   :  { %3482 = dma.done.wait [#allocation4], 128  }
  0xa6   :  { %3483 = vsyncadd [#allocation4], 4294967168 }
  0xa7   :  { %3484 = dma.done.wait [#allocation7], 2176  }
  0xa8   :  { %3485 = vsyncadd [#allocation7], 4294965120 }
  0xa9   :  { %3486 = dma.done.wait [#allocation10], 6144  }
  0xaa   :  { %3487 = vsyncadd [#allocation10], 4294961152 }
  0xab   :  { %3488 = dma.done.wait [#allocation13], 6144  }
  0xac   :  { %3489 = vsyncadd [#allocation13], 4294961152 }
  0xad   :  { %3490 = dma.done.wait [#allocation16], 4096  }
  0xae   :  { %3491 = vsyncadd [#allocation16], 4294963200 }
  0xaf   :  { %3492 = dma.done.wait [#allocation19], 6144  }
  0xb0   :  { %3493 = vsyncadd [#allocation19], 4294961152 }
  0xb1   :  { %3494 = dma.done.wait [#allocation22], 4096  }
  0xb2   :  { %3495 = vsyncadd [#allocation22], 4294963200  ;;  %v3515_v1 = vmov 0   ;;  %v2872_v2 = vld [vmem:[#allocation8 + $0x74] ss:$8 sps:$4 sm:$0xff]   ;;  %s3868_s0 = sld [smem:[#allocation37_spill]] }
  0xb3   :  { %388 = vmatprep.mubr.bf16.mxu0 %v3515_v1  ;;  %526 = vmatprep.mubr.bf16.mxu1 %v3515_v1  ;;  %v2874_v3 = vld [vmem:[#allocation9 + $0x74] ss:$8 sps:$4 sm:$0xff]   ;;  %v2876_v4 = vld [vmem:[#allocation8 + $0x70] ss:$8 sps:$4 sm:$0xff]   ;;  %v2878_v6 = vld [vmem:[#allocation8 + $0x64] ss:$8 sps:$4 sm:$0xff]  }
  0xb4   :  { %2870 = vset.pattern.permute.xlu0 %v3515_v1  ;;  %2871 = vset.pattern.permute.xlu1 %v3515_v1  ;;  %v2877_v5 = vld [vmem:[#allocation9 + $0x70] ss:$8 sps:$4 sm:$0xff]   ;;  %v2880_v7 = vld [vmem:[#allocation9 + $0x64] ss:$8 sps:$4 sm:$0xff]   ;;  %v2882_v8 = vld [vmem:[#allocation8 + $0x60] ss:$8 sps:$4 sm:$0xff]  }
  0xb5   :  { %356 = vmatprep.subr.bf16.mxu0 %v2872_v2  ;;  %494 = vmatprep.subr.bf16.mxu1 %v2874_v3  ;;  %v2883_v9 = vld [vmem:[#allocation9 + $0x60] ss:$8 sps:$4 sm:$0xff]   ;;  %v2884_v10 = vld [vmem:[#allocation8 + $0x54] ss:$8 sps:$4 sm:$0xff]   ;;  %v2888_v12 = vld [vmem:[#allocation8 + $0x50] ss:$8 sps:$4 sm:$0xff]  }
  0xb6   :  { %357 = vmatpush1.bf16.msra.mxu0 %v2876_v4  ;;  %495 = vmatpush1.bf16.msra.mxu1 %v2877_v5  ;;  %v2886_v11 = vld [vmem:[#allocation9 + $0x54] ss:$8 sps:$4 sm:$0xff]   ;;  %v2889_v13 = vld [vmem:[#allocation9 + $0x50] ss:$8 sps:$4 sm:$0xff]   ;;  %v2890_v14 = vld [vmem:[#allocation8 + $0x44] ss:$8 sps:$4 sm:$0xff]  }
  0xb7   :  { %358 = vmatprep.subr.bf16.mxu0 %v2878_v6  ;;  %496 = vmatprep.subr.bf16.mxu1 %v2880_v7  ;;  %v2892_v15 = vld [vmem:[#allocation9 + $0x44] ss:$8 sps:$4 sm:$0xff]   ;;  %v2894_v16 = vld [vmem:[#allocation8 + $0x40] ss:$8 sps:$4 sm:$0xff]   ;;  %v2896_v18 = vld [vmem:[#allocation8 + $0x34] ss:$8 sps:$4 sm:$0xff]  }
  0xb8   :  { %v2895_v17 = vld [vmem:[#allocation9 + $0x40] ss:$8 sps:$4 sm:$0xff]   ;;  %v2898_v19 = vld [vmem:[#allocation9 + $0x34] ss:$8 sps:$4 sm:$0xff]   ;;  %v2900_v20 = vld [vmem:[#allocation8 + $0x30] ss:$8 sps:$4 sm:$0xff]  }
  0xb9   :  { %v2901_v21 = vld [vmem:[#allocation9 + $0x30] ss:$8 sps:$4 sm:$0xff]   ;;  %v2902_v22 = vld [vmem:[#allocation8 + $0x24] ss:$8 sps:$4 sm:$0xff]   ;;  %v2906_v24 = vld [vmem:[#allocation8 + $0x20] ss:$8 sps:$4 sm:$0xff]  }
  0xba   :  { %359 = vmatpush1.bf16.msra.mxu0 %v2882_v8  ;;  %497 = vmatpush1.bf16.msra.mxu1 %v2883_v9  ;;  %v2904_v23 = vld [vmem:[#allocation9 + $0x24] ss:$8 sps:$4 sm:$0xff]   ;;  %v2907_v25 = vld [vmem:[#allocation9 + $0x20] ss:$8 sps:$4 sm:$0xff]   ;;  %v2908_v26 = vld [vmem:[#allocation8 + $0x14] ss:$8 sps:$4 sm:$0xff]  }
  0xbb   :  { %360 = vmatprep.subr.bf16.mxu0 %v2884_v10  ;;  %498 = vmatprep.subr.bf16.mxu1 %v2886_v11  ;;  %v2910_v27 = vld [vmem:[#allocation9 + $0x14] ss:$8 sps:$4 sm:$0xff]   ;;  %v2912_v28 = vld [vmem:[#allocation8 + $0x10] ss:$8 sps:$4 sm:$0xff]   ;;  %v2914_v31 = vld [vmem:[#allocation8 + $0x4] ss:$8 sps:$4 sm:$0xff]  }
  0xbc   :  { %v2913_v29 = vld [vmem:[#allocation9 + $0x10] ss:$8 sps:$4 sm:$0xff]   ;;  %v2916_v32 = vld [vmem:[#allocation9 + $0x4] ss:$8 sps:$4 sm:$0xff]   ;;  %v2918_v33 = vld [vmem:[#allocation8] ss:$8 sps:$4 sm:$0xff]  }
  0xbd   :  { %v257_v30 = vld [vmem:[#allocation6] sm:$0xff]  ;;  %v2919_v35 = vld [vmem:[#allocation9] ss:$8 sps:$4 sm:$0xff]   ;;  %v256_v36 = vld [vmem:[#allocation3] sm:$0xff]  ;;  %s3869_s8 = sld [smem:[#allocation39_spill]]  ;;  %vm876_vm8 = vcmask 7168  }
  0xbe   :  { %361 = vmatpush1.bf16.msra.mxu0 %v2888_v12  ;;  %499 = vmatpush1.bf16.msra.mxu1 %v2889_v13  ;;  %v258_v34 = vrot.slane %v257_v30, 7  ;;  %v2922_v37 = vld [vmem:[#allocation12 + $0x74] ss:$8 sps:$4 sm:$0xff]   ;;  %v3726_v38 = vpack.c.bf16 %v256_v36, %v256_v36  ;;  %v2920_v40 = vld [vmem:[#allocation12 + $0x70] ss:$8 sps:$4 sm:$0xff]   ;;  %s3870_s13 = sld [smem:[#allocation40_spill]] }
  0xbf   :  { %362 = vmatprep.subr.bf16.mxu0 %v2890_v14  ;;  %500 = vmatprep.subr.bf16.mxu1 %v2892_v15  ;;  %v2925_v41 = vld [vmem:[#allocation12 + $0x64] ss:$8 sps:$4 sm:$0xff]   ;;  %v2946_v42 = vld [vmem:[#allocation11 + $0x74] ss:$8 sps:$4 sm:$0xff]   ;;  %v2944_v43 = vld [vmem:[#allocation11 + $0x70] ss:$8 sps:$4 sm:$0xff]  }
  0xc0   :  { %v413_v39 = vpack.c.bf16 %v258_v34, %v257_v30  ;;  %v2949_v44 = vld [vmem:[#allocation11 + $0x64] ss:$8 sps:$4 sm:$0xff]   ;;  %v2923_v45 = vld [vmem:[#allocation12 + $0x60] ss:$8 sps:$4 sm:$0xff]   ;;  %v2928_v46 = vld [vmem:[#allocation12 + $0x54] ss:$8 sps:$4 sm:$0xff]  }
  0xc1   :  { %v2947_v47 = vld [vmem:[#allocation11 + $0x60] ss:$8 sps:$4 sm:$0xff]   ;;  %v2952_v48 = vld [vmem:[#allocation11 + $0x54] ss:$8 sps:$4 sm:$0xff]   ;;  %v2926_v49 = vld [vmem:[#allocation12 + $0x50] ss:$8 sps:$4 sm:$0xff]  }
  0xc2   :  { %363 = vmatpush1.bf16.msra.mxu0 %v2894_v16  ;;  %501 = vmatpush1.bf16.msra.mxu1 %v2895_v17  ;;  %v2931_v50 = vld [vmem:[#allocation12 + $0x44] ss:$8 sps:$4 sm:$0xff]   ;;  %v2950_v51 = vld [vmem:[#allocation11 + $0x50] ss:$8 sps:$4 sm:$0xff]   ;;  %v2929_v53 = vld [vmem:[#allocation12 + $0x40] ss:$8 sps:$4 sm:$0xff]  }
  0xc3   :  { %364 = vmatprep.subr.bf16.mxu0 %v2896_v18  ;;  %502 = vmatprep.subr.bf16.mxu1 %v2898_v19  ;;  %v2955_v52 = vld [vmem:[#allocation11 + $0x44] ss:$8 sps:$4 sm:$0xff]   ;;  %v2934_v54 = vld [vmem:[#allocation12 + $0x34] ss:$8 sps:$4 sm:$0xff]   ;;  %v2953_v55 = vld [vmem:[#allocation11 + $0x40] ss:$8 sps:$4 sm:$0xff]  }
  0xc4   :  { %v2958_v56 = vld [vmem:[#allocation11 + $0x34] ss:$8 sps:$4 sm:$0xff]   ;;  %v2932_v57 = vld [vmem:[#allocation12 + $0x30] ss:$8 sps:$4 sm:$0xff]   ;;  %v2937_v58 = vld [vmem:[#allocation12 + $0x24] ss:$8 sps:$4 sm:$0xff]  }
  0xc5   :  { %v2956_v59 = vld [vmem:[#allocation11 + $0x30] ss:$8 sps:$4 sm:$0xff]   ;;  %v2961_v60 = vld [vmem:[#allocation11 + $0x24] ss:$8 sps:$4 sm:$0xff]   ;;  %v2935_v61 = vld [vmem:[#allocation12 + $0x20] ss:$8 sps:$4 sm:$0xff]  }
  0xc6   :  { %365 = vmatpush1.bf16.msra.mxu0 %v2900_v20  ;;  %503 = vmatpush1.bf16.msra.mxu1 %v2901_v21  ;;  %v2940_v62 = vld [vmem:[#allocation12 + $0x14] ss:$8 sps:$4 sm:$0xff]   ;;  %v2938_v63 = vld [vmem:[#allocation12 + $0x10] ss:$8 sps:$4 sm:$0xff]   ;;  %v2959_v0 = vld [vmem:[#allocation11 + $0x20] ss:$8 sps:$4 sm:$0xff]  }
  0xc7   :  { %366 = vmatprep.subr.bf16.mxu0 %v2902_v22  ;;  %504 = vmatprep.subr.bf16.mxu1 %v2904_v23  ;;  %v2964_v2 = vld [vmem:[#allocation11 + $0x14] ss:$8 sps:$4 sm:$0xff]   ;;  %v2943_v3 = vld [vmem:[#allocation12 + $0x4] ss:$8 sps:$4 sm:$0xff]   ;;  %v2962_v4 = vld [vmem:[#allocation11 + $0x10] ss:$8 sps:$4 sm:$0xff]  }
  0xc8   :  { %v2970_v5 = vld [vmem:[#allocation11 + $0x4] ss:$8 sps:$4 sm:$0xff]   ;;  %v2941_v6 = vld [vmem:[#allocation12] ss:$8 sps:$4 sm:$0xff]   ;;  %v2967_v7 = vld [vmem:[#allocation14 + $0x74] ss:$8 sps:$4 sm:$0xff]  }
  0xc9   :  { %v2968_v8 = vld [vmem:[#allocation11] ss:$8 sps:$4 sm:$0xff]   ;;  %v2976_v9 = vld [vmem:[#allocation11 + $0xf4] ss:$8 sps:$4 sm:$0xff]   ;;  %v2965_v10 = vld [vmem:[#allocation14 + $0x70] ss:$8 sps:$4 sm:$0xff]  }
  0xca   :  { %367 = vmatpush1.bf16.msra.mxu0 %v2906_v24  ;;  %505 = vmatpush1.bf16.msra.mxu1 %v2907_v25  ;;  %v2973_v11 = vld [vmem:[#allocation14 + $0x64] ss:$8 sps:$4 sm:$0xff]   ;;  %v2974_v12 = vld [vmem:[#allocation11 + $0xf0] ss:$8 sps:$4 sm:$0xff]   ;;  %v2971_v14 = vld [vmem:[#allocation14 + $0x60] ss:$8 sps:$4 sm:$0xff]  }
  0xcb   :  { %368 = vmatprep.subr.bf16.mxu0 %v2908_v26  ;;  %506 = vmatprep.subr.bf16.mxu1 %v2910_v27  ;;  %v2982_v13 = vld [vmem:[#allocation11 + $0xe4] ss:$8 sps:$4 sm:$0xff]   ;;  %v2979_v15 = vld [vmem:[#allocation14 + $0x54] ss:$8 sps:$4 sm:$0xff]   ;;  %v2980_v16 = vld [vmem:[#allocation11 + $0xe0] ss:$8 sps:$4 sm:$0xff]  }
  0xcc   :  { %v2988_v17 = vld [vmem:[#allocation11 + $0xd4] ss:$8 sps:$4 sm:$0xff]   ;;  %v2977_v18 = vld [vmem:[#allocation14 + $0x50] ss:$8 sps:$4 sm:$0xff]   ;;  %v2985_v19 = vld [vmem:[#allocation14 + $0x44] ss:$8 sps:$4 sm:$0xff]  }
  0xcd   :  { %v2986_v20 = vld [vmem:[#allocation11 + $0xd0] ss:$8 sps:$4 sm:$0xff]   ;;  %v2994_v21 = vld [vmem:[#allocation11 + $0xc4] ss:$8 sps:$4 sm:$0xff]   ;;  %v2983_v22 = vld [vmem:[#allocation14 + $0x40] ss:$8 sps:$4 sm:$0xff]  }
  0xce   :  { %369 = vmatpush1.bf16.msra.mxu0 %v2912_v28  ;;  %507 = vmatpush1.bf16.msra.mxu1 %v2913_v29  ;;  %v2991_v23 = vld [vmem:[#allocation14 + $0x34] ss:$8 sps:$4 sm:$0xff]   ;;  %v2992_v24 = vld [vmem:[#allocation11 + $0xc0] ss:$8 sps:$4 sm:$0xff]   ;;  %v2989_v25 = vld [vmem:[#allocation14 + $0x30] ss:$8 sps:$4 sm:$0xff]  }
  0xcf   :  { %370 = vmatprep.subr.bf16.mxu0 %v2914_v31  ;;  %508 = vmatprep.subr.bf16.mxu1 %v2916_v32  ;;  %v2997_v26 = vld [vmem:[#allocation14 + $0x24] ss:$8 sps:$4 sm:$0xff]   ;;  %v2995_v27 = vld [vmem:[#allocation14 + $0x20] ss:$8 sps:$4 sm:$0xff]   ;;  %v3000_v28 = vld [vmem:[#allocation11 + $0xb4] ss:$8 sps:$4 sm:$0xff]  }
  0xd0   :  { %v2998_v29 = vld [vmem:[#allocation11 + $0xb0] ss:$8 sps:$4 sm:$0xff]   ;;  %v3003_v30 = vld [vmem:[#allocation14 + $0x14] ss:$8 sps:$4 sm:$0xff]   ;;  %v3006_v32 = vld [vmem:[#allocation11 + $0xa4] ss:$8 sps:$4 sm:$0xff]  }
  0xd1   :  { %v3001_v31 = vld [vmem:[#allocation14 + $0x10] ss:$8 sps:$4 sm:$0xff]   ;;  %v3009_v34 = vld [vmem:[#allocation14 + $0x4] ss:$8 sps:$4 sm:$0xff]   ;;  %v3012_v36 = vld [vmem:[#allocation11 + $0x94] ss:$8 sps:$4 sm:$0xff]  }
  0xd2   :  { %371 = vmatpush1.bf16.msra.mxu0 %v2918_v33  ;;  %509 = vmatpush1.bf16.msra.mxu1 %v2919_v35  ;;  %v3004_v33 = vld [vmem:[#allocation11 + $0xa0] ss:$8 sps:$4 sm:$0xff]  }
  0xd3   :  { %1147 = vmatprep.subr.bf16.mxu1 %v2922_v37  ;;  %775 = vmatprep.subr.bf16.mxu0 %v2946_v42  ;;  %v3007_v35 = vld [vmem:[#allocation14] ss:$8 sps:$4 sm:$0xff]   ;;  %v3010_v37 = vld [vmem:[#allocation11 + $0x90] ss:$8 sps:$4 sm:$0xff]  }
  0xd4   :  { %v3019_v42 = vld [vmem:[#allocation14 + $0xe0] ss:$8 sps:$4 sm:$0xff]  }
  0xd5   :  { %389 = vmatmul.mubr.bf16.vlgmr.msra.gmra.mxu0 %v3726_v38  ;;  %527 = vmatmul.mubr.bf16.vlgmr.msra.gmra.mxu1 %v413_v39  ;;  %v3013_v39 = vld [vmem:[#allocation14 + $0xf0] ss:$8 sps:$4 sm:$0xff]  }
  0xd6   :  { %1148 = vmatpush1.bf16.msra.mxu1 %v2920_v40  ;;  %1179 = vmatprep.mubr.bf16.mxu1 %v3515_v1  ;;  %v3016_v40 = vld [vmem:[#allocation11 + $0x80] ss:$8 sps:$4 sm:$0xff]  }
  0xd7   :  { %1149 = vmatprep.subr.bf16.mxu1 %v2925_v41  ;;  %776 = vmatpush1.bf16.msra.mxu0 %v2944_v43  ;;  %v3018_v41 = vld [vmem:[#allocation11 + $0x84] ss:$8 sps:$4 sm:$0xff]  }
  0xd8   :  { %777 = vmatprep.subr.bf16.mxu0 %v2949_v44  ;;  %v3021_v43 = vld [vmem:[#allocation14 + $0xe4] ss:$8 sps:$4 sm:$0xff]   ;;  %v3024_v44 = vld [vmem:[#allocation14 + $0xd4] ss:$8 sps:$4 sm:$0xff]  }
  0xda   :  { %1150 = vmatpush1.bf16.msra.mxu1 %v2923_v45  ;;  %v3022_v45 = vld [vmem:[#allocation14 + $0xd0] ss:$8 sps:$4 sm:$0xff]  }
  0xdb   :  { %1151 = vmatprep.subr.bf16.mxu1 %v2928_v46  ;;  %778 = vmatpush1.bf16.msra.mxu0 %v2947_v47  ;;  %v3027_v46 = vld [vmem:[#allocation14 + $0xc4] ss:$8 sps:$4 sm:$0xff]   ;;  %v3025_v47 = vld [vmem:[#allocation14 + $0xc0] ss:$8 sps:$4 sm:$0xff]  }
  0xdc   :  { %779 = vmatprep.subr.bf16.mxu0 %v2952_v48  ;;  %v3030_v48 = vld [vmem:[#allocation14 + $0xb4] ss:$8 sps:$4 sm:$0xff]  }
  0xde   :  { %1152 = vmatpush1.bf16.msra.mxu1 %v2926_v49  ;;  %v3028_v49 = vld [vmem:[#allocation14 + $0xb0] ss:$8 sps:$4 sm:$0xff]  }
  0xdf   :  { %1153 = vmatprep.subr.bf16.mxu1 %v2931_v50  ;;  %780 = vmatpush1.bf16.msra.mxu0 %v2950_v51  ;;  %v3033_v50 = vld [vmem:[#allocation14 + $0xa4] ss:$8 sps:$4 sm:$0xff]   ;;  %v3031_v51 = vld [vmem:[#allocation14 + $0xa0] ss:$8 sps:$4 sm:$0xff]  }
  0xe0   :  { %781 = vmatprep.subr.bf16.mxu0 %v2955_v52  ;;  %v3036_v52 = vld [vmem:[#allocation14 + $0x94] ss:$8 sps:$4 sm:$0xff]  }
  0xe2   :  { %1154 = vmatpush1.bf16.msra.mxu1 %v2929_v53  ;;  %v3034_v53 = vld [vmem:[#allocation14 + $0x90] ss:$8 sps:$4 sm:$0xff]  }
  0xe3   :  { %1155 = vmatprep.subr.bf16.mxu1 %v2934_v54  ;;  %782 = vmatpush1.bf16.msra.mxu0 %v2953_v55  ;;  %v3039_v54 = vld [vmem:[#allocation14 + $0x84] ss:$8 sps:$4 sm:$0xff]   ;;  %v3037_v55 = vld [vmem:[#allocation14 + $0x80] ss:$8 sps:$4 sm:$0xff]  }
  0xe4   :  { %783 = vmatprep.subr.bf16.mxu0 %v2958_v56  ;;  %v3042_v56 = vld [vmem:[#allocation18 + $0x74] ss:$8 sps:$4 sm:$0xff]  }
  0xe6   :  { %1156 = vmatpush1.bf16.msra.mxu1 %v2932_v57  ;;  %v543_v57 = vlaneseq }
  0xe7   :  { %1157 = vmatprep.subr.bf16.mxu1 %v2937_v58  ;;  %784 = vmatpush1.bf16.msra.mxu0 %v2956_v59 }
  0xe8   :  { %785 = vmatprep.subr.bf16.mxu0 %v2961_v60  ;;  %v3732_v58 = vshrl.u32 %v543_v57, 7 }
  0xea   :  { %1158 = vmatpush1.bf16.msra.mxu1 %v2935_v61  ;;  %v3735_v59 = vsub.s32 1, %v3732_v58  ;;  %v3738_v60 = vsub.s32 0, %v3732_v58 }
  0xeb   :  { %1159 = vmatprep.subr.bf16.mxu1 %v2940_v62  ;;  %786 = vmatpush1.bf16.msra.mxu0 %v2959_v0 }
  0xec   :  { %787 = vmatprep.subr.bf16.mxu0 %v2964_v2 }
  0xee   :  { %1160 = vmatpush1.bf16.msra.mxu1 %v2938_v63  ;;  %v541_v63 = vld [vmem:[%s3868_s0] sm:$0x3] }
  0xef   :  { %1161 = vmatprep.subr.bf16.mxu1 %v2943_v3  ;;  %788 = vmatpush1.bf16.msra.mxu0 %v2962_v4  ;;  %v550_v3 = vrot.slane %v541_v63, %v3735_v59 }
  0xf0   :  { %789 = vmatprep.subr.bf16.mxu0 %v2970_v5  ;;  %v546_v5 = vrot.slane %v541_v63, %v3738_v60  ;;  %v3067_v63 = vld [vmem:[#allocation15 + $0x30] sm:$0xff]  }
  0xf2   :  { %1162 = vmatpush1.bf16.msra.mxu1 %v2941_v6 }
  0xf3   :  { %1363 = vmatprep.subr.bf16.mxu1 %v2967_v7  ;;  %790 = vmatpush1.bf16.msra.mxu0 %v2968_v8 }
  0xf4   :  { %791 = vmatprep.subr.bf16.mxu0 %v2976_v9 }
  0xf5   :  { %1180 = vmatmul.mubr.bf16.vlgmr.msra.gmra.mxu1 %v3726_v38  ;;  %v3015_v38 = vld [vmem:[#allocation14 + $0xf4] ss:$8 sps:$4 sm:$0xff]  }
  0xf6   :  { %1364 = vmatpush1.bf16.msra.mxu1 %v2965_v10 }
  0xf7   :  { %1365 = vmatprep.subr.bf16.mxu1 %v2973_v11  ;;  %792 = vmatpush2.bf16.msra.mxu0 %v2974_v12 }
  0xf8   :  { %793 = vmatprep.subr.bf16.mxu0 %v2982_v13 }
  0xfa   :  { %1366 = vmatpush1.bf16.msra.mxu1 %v2971_v14 }
  0xfb   :  { %1367 = vmatprep.subr.bf16.mxu1 %v2979_v15  ;;  %794 = vmatpush2.bf16.msra.mxu0 %v2980_v16 }
  0xfc   :  { %795 = vmatprep.subr.bf16.mxu0 %v2988_v17 }
  0xfe   :  { %1368 = vmatpush1.bf16.msra.mxu1 %v2977_v18 }
  0xff   :  { %1369 = vmatprep.subr.bf16.mxu1 %v2985_v19  ;;  %796 = vmatpush2.bf16.msra.mxu0 %v2986_v20 }
 0x100   :  { %797 = vmatprep.subr.bf16.mxu0 %v2994_v21 }
 0x102   :  { %1370 = vmatpush1.bf16.msra.mxu1 %v2983_v22 }
 0x103   :  { %1371 = vmatprep.subr.bf16.mxu1 %v2991_v23  ;;  %798 = vmatpush2.bf16.msra.mxu0 %v2992_v24 }
 0x104   :  { %799 = vmatprep.subr.bf16.mxu0 %v3000_v28 }
 0x106   :  { %1372 = vmatpush1.bf16.msra.mxu1 %v2989_v25 }
 0x107   :  { %1373 = vmatprep.subr.bf16.mxu1 %v2997_v26  ;;  %800 = vmatpush2.bf16.msra.mxu0 %v2998_v29 }
 0x108   :  { %801 = vmatprep.subr.bf16.mxu0 %v3006_v32 }
 0x10a   :  { %1374 = vmatpush1.bf16.msra.mxu1 %v2995_v27  ;;  %v949_v27 = vld [vmem:[%s3835_s10] sm:$0x3] }
 0x10b   :  { %1375 = vmatprep.subr.bf16.mxu1 %v3003_v30  ;;  %802 = vmatpush2.bf16.msra.mxu0 %v3004_v33  ;;  %v1060_v28 = vrot.slane %v949_v27, %v3738_v60  ;;  %v1064_v29 = vrot.slane %v949_v27, %v3735_v59 }
 0x10c   :  { %803 = vmatprep.subr.bf16.mxu0 %v3012_v36 }
 0x10e   :  { %1376 = vmatpush1.bf16.msra.mxu1 %v3001_v31 }
 0x10f   :  { %1377 = vmatprep.subr.bf16.mxu1 %v3009_v34  ;;  %804 = vmatpush2.bf16.msra.mxu0 %v3010_v37 }
 0x110   :  { %805 = vmatprep.subr.bf16.mxu0 %v3018_v41  ;;  %v3045_v41 = vld [vmem:[#allocation18 + $0x64] ss:$8 sps:$4 sm:$0xff]  }
 0x112   :  { %1378 = vmatpush1.bf16.msra.mxu1 %v3007_v35 }
 0x113   :  { %1379 = vmatprep.subr.bf16.mxu1 %v3015_v38  ;;  %806 = vmatpush2.bf16.msra.mxu0 %v3016_v40 }
 0x116   :  { %1380 = vmatpush2.bf16.msra.mxu1 %v3013_v39  ;;  %v3040_v39 = vld [vmem:[#allocation18 + $0x70] ss:$8 sps:$4 sm:$0xff]  }
 0x117   :  { %1381 = vmatprep.subr.bf16.mxu1 %v3021_v43  ;;  %v3048_v43 = vld [vmem:[#allocation18 + $0x54] ss:$8 sps:$4 sm:$0xff]  }
 0x11a   :  { %1382 = vmatpush2.bf16.msra.mxu1 %v3019_v42  ;;  %v3043_v42 = vld [vmem:[#allocation18 + $0x60] ss:$8 sps:$4 sm:$0xff]  }
 0x11b   :  { %1383 = vmatprep.subr.bf16.mxu1 %v3024_v44  ;;  %v3046_v44 = vld [vmem:[#allocation18 + $0x50] ss:$8 sps:$4 sm:$0xff]  }
 0x11e   :  { %1384 = vmatpush2.bf16.msra.mxu1 %v3022_v45  ;;  %v3051_v45 = vld [vmem:[#allocation18 + $0x44] ss:$8 sps:$4 sm:$0xff]  }
 0x11f   :  { %1385 = vmatprep.subr.bf16.mxu1 %v3027_v46  ;;  %v3049_v46 = vld [vmem:[#allocation18 + $0x40] ss:$8 sps:$4 sm:$0xff]  }
 0x122   :  { %1386 = vmatpush2.bf16.msra.mxu1 %v3025_v47  ;;  %v3054_v47 = vld [vmem:[#allocation18 + $0x34] ss:$8 sps:$4 sm:$0xff]  }
 0x123   :  { %1387 = vmatprep.subr.bf16.mxu1 %v3030_v48  ;;  %v3052_v48 = vld [vmem:[#allocation18 + $0x30] ss:$8 sps:$4 sm:$0xff]  }
 0x126   :  { %1388 = vmatpush2.bf16.msra.mxu1 %v3028_v49  ;;  %v3057_v49 = vld [vmem:[#allocation18 + $0x24] ss:$8 sps:$4 sm:$0xff]  }
 0x127   :  { %1389 = vmatprep.subr.bf16.mxu1 %v3033_v50  ;;  %v3055_v50 = vld [vmem:[#allocation18 + $0x20] ss:$8 sps:$4 sm:$0xff]  }
 0x12a   :  { %1390 = vmatpush2.bf16.msra.mxu1 %v3031_v51  ;;  %v3060_v51 = vld [vmem:[#allocation18 + $0x14] ss:$8 sps:$4 sm:$0xff]  }
 0x12b   :  { %1391 = vmatprep.subr.bf16.mxu1 %v3036_v52  ;;  %v3063_v52 = vld [vmem:[#allocation18 + $0x4] ss:$8 sps:$4 sm:$0xff]  }
 0x12e   :  { %1392 = vmatpush2.bf16.msra.mxu1 %v3034_v53  ;;  %v3061_v53 = vld [vmem:[#allocation18] ss:$8 sps:$4 sm:$0xff]  }
 0x12f   :  { %1393 = vmatprep.subr.bf16.mxu1 %v3039_v54  ;;  %v3751_v54 = vld [vmem:[#allocation6] sm:$0xff] }
 0x132   :  { %1394 = vmatpush2.bf16.msra.mxu1 %v3037_v55  ;;  %v1833_v55 = vpack.c.bf16 %v3751_v54, %v3751_v54 }
 0x133   :  { %1925 = vmatprep.subr.bf16.mxu1 %v3042_v56  ;;  %v3064_v56 = vld [vmem:[#allocation15 + $0x78] sm:$0xff]  }
 0x134   :  { %2763 = vmatprep.subr.bf16.mxu0 %v3064_v56 }
 0x195   :  { %v390_v61 = vpop.f32.mrf.mxu0  ;;  %v528_v62 = vpop.f32.mrf.mxu1 }
 0x196   :  { %v537_v4 = vadd.f32 %v528_v62, %v390_v61  ;;  %v3066_v62 = vld [vmem:[#allocation15 + $0x70] sm:$0xff]  }
 0x197   :  { %v392_v0 = vpop.f32.mrf.mxu0  ;;  %v530_v2 = vpop.f32.mrf.mxu1 }
 0x198   :  { %v538_v6 = vadd.f32 %v530_v2, %v392_v0  ;;  %v553_v13 = vadd.f32 %v546_v5, %v537_v4  ;;  %v3069_v2 = vld [vmem:[#allocation15 + $0x28] sm:$0xff]   ;;  %v3071_v4 = vld [vmem:[#allocation15 + $0x20] sm:$0xff]  }
 0x199   :  { %v532_v7 = vpop.f32.mrf.mxu1  ;;  %v394_v8 = vpop.f32.mrf.mxu0 }
 0x19a   :  { %v539_v9 = vadd.f32 %v532_v7, %v390_v61  ;;  %v554_v10 = vadd.f32 %v550_v3, %v538_v6  ;;  %v561_v19 = vmul.f32 0.2, %v553_v13  ;;  %vm557_vm2 = vcmp.gt.f32.partialorder %v553_v13, 0.0  ;;  %v3065_v61 = vld [vmem:[#allocation15 + $0x38] sm:$0xff]   ;;  %v3074_v7 = vld [vmem:[#allocation15 + $0x50] sm:$0xff]  }
 0x19b   :  { %v534_v11 = vpop.f32.mrf.mxu1  ;;  %v395_v12 = vpop.f32.mrf.mxu0  ;;  %v3073_v6 = vld [vmem:[#allocation15 + $0x18] sm:$0xff]   ;;  %v3075_v8 = vld [vmem:[#allocation15 + $0x10] sm:$0xff]  }
 0x19c   :  { %v555_v14 = vadd.f32 %v546_v5, %v539_v9  ;;  %v540_v15 = vadd.f32 %v534_v11, %v392_v0  ;;  %v562_v17 = vmul.f32 0.2, %v554_v10  ;;  %vm558_vm1 = vcmp.gt.f32.partialorder %v554_v10, 0.0  ;;  %v3068_v0 = vld [vmem:[#allocation15 + $0x68] sm:$0xff]   ;;  %v3072_v5 = vld [vmem:[#allocation15 + $0x58] sm:$0xff]   ;;  %v3078_v11 = vld [vmem:[#allocation15 + $0x40] sm:$0xff]  }
 0x19d   :  { %v565_v24 = vsel %vm557_vm2, %v553_v13, %v561_v19  ;;  %v3076_v9 = vld [vmem:[#allocation15 + $0x48] sm:$0xff]   ;;  %v3079_v12 = vld [vmem:[#allocation15] sm:$0xff]   ;;  %v3080_v13 = vld [vmem:[#allocation17 + $0x78] sm:$0xff]  }
 0x19e   :  { %v563_v16 = vmul.f32 0.2, %v555_v14  ;;  %vm559_vm0 = vcmp.gt.f32.partialorder %v555_v14, 0.0  ;;  %v556_v18 = vadd.f32 %v550_v3, %v540_v15  ;;  %v566_v22 = vsel %vm558_vm1, %v554_v10, %v562_v17  ;;  %v3070_v3 = vld [vmem:[#allocation15 + $0x60] sm:$0xff]   ;;  %v3077_v10 = vld [vmem:[#allocation15 + $0x8] sm:$0xff]  }
 0x19f   :  { %v830_v19 = vld [vmem:[%s3870_s13] sm:$0x3] }
 0x1a0   :  { %vm560_vm3 = vcmp.gt.f32.partialorder %v556_v18, 0.0  ;;  %v564_v20 = vmul.f32 0.2, %v556_v18  ;;  %v567_v21 = vsel %vm559_vm0, %v555_v14, %v563_v16  ;;  %v603_v14 = vld [vmem:[%s3869_s8] sm:$0x3] }
 0x1a1   :  { %v601_v26 = vpack.c.bf16 %v567_v21, %v565_v24  ;;  %v608_v15 = vrot.slane %v603_v14, %v3738_v60  ;;  %v612_v16 = vrot.slane %v603_v14, %v3735_v59  ;;  %v845_v24 = vsub.s32 2, %v3732_v58  ;;  %v3090_v14 = vld [vmem:[#allocation17 + $0x50] sm:$0xff]  }
 0x1a2   :  { %v568_v23 = vsel %vm560_vm3, %v556_v18, %v564_v20 }
 0x1a3   :  { %v602_v25 = vpack.c.bf16 %v568_v23, %v566_v22  ;;  %v831_v23 = vunpack.c.l.bf16 %v830_v19 }
 0x1a5   :  { %807 = vmatprep.mubr.bf16.mxu0 %v602_v25 }
 0x1a6   :  { %808 = vmatmul.mubr.bf16.vlgmr.msra.gmra.mxu0 %v601_v26 }
 0x1a7   :  { %2764 = vmatpush3.bf16.msra.mxu0 %v3065_v61 }
 0x1a8   :  { %2765 = vmatprep.subr.bf16.mxu0 %v3066_v62 }
 0x1ab   :  { %2766 = vmatpush3.bf16.msra.mxu0 %v3067_v63 }
 0x1ac   :  { %2767 = vmatprep.subr.bf16.mxu0 %v3068_v0 }
 0x1af   :  { %2768 = vmatpush3.bf16.msra.mxu0 %v3069_v2 }
 0x1b0   :  { %2769 = vmatprep.subr.bf16.mxu0 %v3070_v3 }
 0x1b3   :  { %2770 = vmatpush3.bf16.msra.mxu0 %v3071_v4  ;;  %v3081_v4 = vld [vmem:[#allocation17 + $0x38] sm:$0xff]  }
 0x1b4   :  { %2771 = vmatprep.subr.bf16.mxu0 %v3072_v5 }
 0x1b5   :  { %v1181_v30 = vpop.f32.mrf.mxu1 }
 0x1b6   :  { %v1182_v31 = vadd.f32 %v1181_v30, %v1060_v28 }
 0x1b7   :  { %v1183_v32 = vpop.f32.mrf.mxu1  ;;  %2772 = vmatpush3.bf16.msra.mxu0 %v3073_v6  ;;  %v3082_v6 = vld [vmem:[#allocation17 + $0x70] sm:$0xff]  }
 0x1b8   :  { %v1184_v33 = vadd.f32 %v1183_v32, %v1064_v29  ;;  %v1188_v34 = vmax.f32 %v1182_v31, 0.0  ;;  %2773 = vmatprep.subr.bf16.mxu0 %v3074_v7  ;;  %v842_v31 = vrot.slane %v831_v23, %v3738_v60  ;;  %v846_v32 = vrot.slane %v831_v23, %v845_v24  ;;  %v3083_v7 = vld [vmem:[#allocation17 + $0x30] sm:$0xff]   ;;  %v3095_v23 = vld [vmem:[#allocation17] sm:$0xff]  }
 0x1b9   :  { %v1185_v35 = vpop.f32.mrf.mxu1 }
 0x1ba   :  { %v1189_v36 = vmax.f32 %v1184_v33, 0.0  ;;  %v1190_v40 = vpack.c.bf16 %v1188_v34, %v1188_v34 }
 0x1bb   :  { %v1186_v37 = vpop.f32.mrf.mxu1  ;;  %2774 = vmatpush3.bf16.msra.mxu0 %v3075_v8  ;;  %v3084_v8 = vld [vmem:[#allocation17 + $0x68] sm:$0xff]  }
 0x1bc   :  { %v1191_v38 = vpack.c.bf16 %v1189_v36, %v1189_v36  ;;  %2775 = vmatprep.subr.bf16.mxu0 %v3076_v9  ;;  %v3085_v9 = vld [vmem:[#allocation17 + $0x28] sm:$0xff]  }
 0x1be   :  { %1395 = vmatprep.mubr.bf16.mxu1 %v1191_v38 }
 0x1bf   :  { %1396 = vmatmul.mubr.bf16.vlgmr.msra.gmra.mxu1 %v1190_v40  ;;  %2776 = vmatpush3.bf16.msra.mxu0 %v3077_v10  ;;  %v852_v40 = vrot.slane %v842_v31, %v3738_v60  ;;  %v3086_v10 = vld [vmem:[#allocation17 + $0x60] sm:$0xff]  }
 0x1c0   :  { %1926 = vmatpush1.bf16.msra.mxu1 %v3040_v39  ;;  %1957 = vmatprep.mubr.bf16.mxu1 %v3515_v1  ;;  %v3058_v1 = vld [vmem:[#allocation18 + $0x10] ss:$8 sps:$4 sm:$0xff]   ;;  %v3101_v31 = vld [vmem:[#allocation20 + $0x64] ss:$8 sps:$4 sm:$0xff]  }
 0x1c1   :  { %1927 = vmatprep.subr.bf16.mxu1 %v3045_v41  ;;  %2777 = vmatprep.subr.bf16.mxu0 %v3078_v11  ;;  %v856_v41 = vrot.slane %v846_v32, %v3738_v60  ;;  %v3087_v11 = vld [vmem:[#allocation17 + $0x20] sm:$0xff]  }
 0x1c2   :  { %v3099_v32 = vld [vmem:[#allocation20 + $0x60] ss:$8 sps:$4 sm:$0xff]  }
 0x1c3   :  { %2778 = vmatpush3.bf16.msra.mxu0 %v3079_v12  ;;  %v3088_v12 = vld [vmem:[#allocation17 + $0x58] sm:$0xff]  }
 0x1c4   :  { %1928 = vmatpush1.bf16.msra.mxu1 %v3043_v42  ;;  %2785 = vmatprep.subr.bf16.mxu0 %v3080_v13  ;;  %v3089_v13 = vld [vmem:[#allocation17 + $0x18] sm:$0xff]  }
 0x1c5   :  { %1929 = vmatprep.subr.bf16.mxu1 %v3048_v43 }
 0x1c8   :  { %1930 = vmatpush1.bf16.msra.mxu1 %v3046_v44 }
 0x1c9   :  { %1931 = vmatprep.subr.bf16.mxu1 %v3051_v45 }
 0x1cc   :  { %1932 = vmatpush1.bf16.msra.mxu1 %v3049_v46 }
 0x1cd   :  { %1933 = vmatprep.subr.bf16.mxu1 %v3054_v47 }
 0x1d0   :  { %1934 = vmatpush1.bf16.msra.mxu1 %v3052_v48 }
 0x1d1   :  { %1935 = vmatprep.subr.bf16.mxu1 %v3057_v49  ;;  %v982_v49 = vld [vmem:[%s3837_s12] sm:$0x3] }
 0x1d4   :  { %1936 = vmatpush1.bf16.msra.mxu1 %v3055_v50 }
 0x1d5   :  { %1937 = vmatprep.subr.bf16.mxu1 %v3060_v51  ;;  %v1196_v51 = vrot.slane %v982_v49, %v3738_v60 }
 0x1d8   :  { %1938 = vmatpush1.bf16.msra.mxu1 %v3058_v1 }
 0x1d9   :  { %1939 = vmatprep.subr.bf16.mxu1 %v3063_v52  ;;  %v1200_v52 = vrot.slane %v982_v49, %v3735_v59  ;;  %v3126_v49 = vld [vmem:[#allocation20 + $0xd0] ss:$8 sps:$4 sm:$0xff]  }
 0x1dc   :  { %1940 = vmatpush1.bf16.msra.mxu1 %v3061_v53 }
 0x1df   :  { %1958 = vmatmul.mubr.bf16.vlgmr.msra.gmra.mxu1 %v1833_v55 }
 0x266   :  { %v809_v17 = vpop.f32.mrf.mxu0 }
 0x267   :  { %v810_v18 = vadd.f32 %v809_v17, %v608_v15  ;;  %v3775_v17 = vld [vmem:[%s3843_s18] sm:$0x3] }
 0x268   :  { %v811_v20 = vpop.f32.mrf.mxu0  ;;  %v1842_v19 = vrot.slane %v3775_v17, %v3735_v59 }
 0x269   :  { %v812_v21 = vadd.f32 %v811_v20, %v612_v16  ;;  %v822_v25 = vmul.f32 0.2, %v810_v18  ;;  %vm818_vm4 = vcmp.gt.f32.partialorder %v810_v18, 0.0  ;;  %v3094_v20 = vld [vmem:[#allocation17 + $0x40] sm:$0xff]  }
 0x26a   :  { %v813_v22 = vpop.f32.mrf.mxu0 }
 0x26b   :  { %v814_v26 = vadd.f32 %v813_v22, %v608_v15  ;;  %v823_v28 = vmul.f32 0.2, %v812_v21  ;;  %vm819_vm6 = vcmp.gt.f32.partialorder %v812_v21, 0.0  ;;  %v826_v33 = vsel %vm818_vm4, %v810_v18, %v822_v25  ;;  %v3091_v15 = vld [vmem:[#allocation17 + $0x10] sm:$0xff]   ;;  %v3093_v18 = vld [vmem:[#allocation17 + $0x8] sm:$0xff]  }
 0x26c   :  { %v815_v27 = vpop.f32.mrf.mxu0  ;;  %v3098_v25 = vld [vmem:[#allocation20 + $0x74] ss:$8 sps:$4 sm:$0xff]  }
 0x26d   :  { %vm820_vm5 = vcmp.gt.f32.partialorder %v814_v26, 0.0  ;;  %v824_v29 = vmul.f32 0.2, %v814_v26  ;;  %v816_v30 = vadd.f32 %v815_v27, %v612_v16  ;;  %v827_v37 = vsel %vm819_vm6, %v812_v21, %v823_v28  ;;  %v3092_v16 = vld [vmem:[#allocation17 + $0x48] sm:$0xff]  }
 0x26f   :  { %v828_v34 = vsel %vm820_vm5, %v814_v26, %v824_v29  ;;  %vm821_vm7 = vcmp.gt.f32.partialorder %v816_v30, 0.0  ;;  %v825_v35 = vmul.f32 0.2, %v816_v30  ;;  %v3096_v29 = vld [vmem:[#allocation20 + $0x70] ss:$8 sps:$4 sm:$0xff]  }
 0x270   :  { %v832_v36 = vpack.c.bf16 %v828_v34, %v826_v33  ;;  %v3104_v33 = vld [vmem:[#allocation20 + $0x54] ss:$8 sps:$4 sm:$0xff]   ;;  %v3102_v34 = vld [vmem:[#allocation20 + $0x50] ss:$8 sps:$4 sm:$0xff]  }
 0x271   :  { %v829_v38 = vsel %vm821_vm7, %v816_v30, %v825_v35  ;;  %v3107_v35 = vld [vmem:[#allocation20 + $0x44] ss:$8 sps:$4 sm:$0xff]  }
 0x272   :  { %v833_v58 = vpack.c.bf16 %v829_v38, %v827_v37  ;;  %v834_v39 = vunpack.c.l.bf16 %v832_v36  ;;  %v836_v46 = vunpack.c.h.bf16 %v832_v36  ;;  %v3105_v36 = vld [vmem:[#allocation20 + $0x40] ss:$8 sps:$4 sm:$0xff]   ;;  %v3110_v37 = vld [vmem:[#allocation20 + $0x34] ss:$8 sps:$4 sm:$0xff]   ;;  %v3108_v38 = vld [vmem:[#allocation20 + $0x30] ss:$8 sps:$4 sm:$0xff]  }
 0x274   :  { %v835_v42 = vunpack.c.l.bf16 %v833_v58  ;;  %v837_v43 = vunpack.c.h.bf16 %v833_v58  ;;  %v857_v44 = vmul.f32 %v852_v40, %v834_v39  ;;  %v859_v50 = vmul.f32 %v852_v40, %v836_v46  ;;  %v3113_v58 = vld [vmem:[#allocation20 + $0x24] ss:$8 sps:$4 sm:$0xff]   ;;  %v3111_v39 = vld [vmem:[#allocation20 + $0x20] ss:$8 sps:$4 sm:$0xff]   ;;  %v3116_v40 = vld [vmem:[#allocation20 + $0x14] ss:$8 sps:$4 sm:$0xff]  }
 0x275   :  { %v3125_v46 = vld [vmem:[#allocation20 + $0xe4] ss:$8 sps:$4 sm:$0xff]  }
 0x276   :  { %v858_v45 = vmul.f32 %v856_v41, %v835_v42  ;;  %v860_v48 = vmul.f32 %v856_v41, %v837_v43  ;;  %v3114_v41 = vld [vmem:[#allocation20 + $0x10] ss:$8 sps:$4 sm:$0xff]   ;;  %v3119_v42 = vld [vmem:[#allocation20 + $0x4] ss:$8 sps:$4 sm:$0xff]   ;;  %v3117_v43 = vld [vmem:[#allocation20] ss:$8 sps:$4 sm:$0xff]  }
 0x278   :  { %v861_v47 = vadd.f32 %v858_v45, %v857_v44  ;;  %v864_v1 = vadd.f32 %v860_v48, %v859_v50  ;;  %v3122_v44 = vld [vmem:[#allocation20 + $0xf4] ss:$8 sps:$4 sm:$0xff]   ;;  %v3120_v45 = vld [vmem:[#allocation20 + $0xf0] ss:$8 sps:$4 sm:$0xff]   ;;  %v3131_v50 = vld [vmem:[#allocation20 + $0xc4] ss:$8 sps:$4 sm:$0xff]  }
 0x279   :  { %v3128_v48 = vld [vmem:[#allocation20 + $0xd4] ss:$8 sps:$4 sm:$0xff]  }
 0x27a   :  { %862 = vadd.xlane.f32.xlu0 %v861_v47  ;;  %v3123_v47 = vld [vmem:[#allocation20 + $0xe0] ss:$8 sps:$4 sm:$0xff]  }
 0x27e   :  { %865 = vadd.xlane.f32.xlu0 %v864_v1  ;;  %v3134_v1 = vld [vmem:[#allocation20 + $0xb4] ss:$8 sps:$4 sm:$0xff]  }
 0x27f   :  { %v1397_v53 = vpop.f32.mrf.mxu1 }
 0x280   :  { %v1398_v55 = vadd.f32 %v1397_v53, %v1196_v51  ;;  %v3129_v51 = vld [vmem:[#allocation20 + $0xc0] ss:$8 sps:$4 sm:$0xff]   ;;  %v3137_v53 = vld [vmem:[#allocation20 + $0xa4] ss:$8 sps:$4 sm:$0xff]  }
 0x281   :  { %v1399_v56 = vpop.f32.mrf.mxu1 }
 0x282   :  { %v1400_v61 = vadd.f32 %v1399_v56, %v1200_v52  ;;  %v1404_v62 = vmax.f32 %v1398_v55, 0.0  ;;  %v3132_v52 = vld [vmem:[#allocation20 + $0xb0] ss:$8 sps:$4 sm:$0xff]   ;;  %v3135_v55 = vld [vmem:[#allocation20 + $0xa0] ss:$8 sps:$4 sm:$0xff]   ;;  %v1838_v56 = vrot.slane %v3775_v17, %v3738_v60 }
 0x283   :  { %v1401_v63 = vpop.f32.mrf.mxu1 }
 0x284   :  { %v1405_v0 = vmax.f32 %v1400_v61, 0.0  ;;  %v1406_v5 = vpack.c.bf16 %v1404_v62, %v1404_v62  ;;  %v3140_v61 = vld [vmem:[#allocation20 + $0x94] ss:$8 sps:$4 sm:$0xff]   ;;  %v3138_v62 = vld [vmem:[#allocation20 + $0x90] ss:$8 sps:$4 sm:$0xff]  }
 0x285   :  { %v1402_v2 = vpop.f32.mrf.mxu1 }
 0x286   :  { %v1407_v3 = vpack.c.bf16 %v1405_v0, %v1405_v0  ;;  %v3143_v0 = vld [vmem:[#allocation20 + $0x84] ss:$8 sps:$4 sm:$0xff]   ;;  %v3141_v2 = vld [vmem:[#allocation20 + $0x80] ss:$8 sps:$4 sm:$0xff]  }
 0x288   :  { %1542 = vmatprep.mubr.bf16.mxu0 %v1407_v3 }
 0x289   :  { %1543 = vmatmul.mubr.bf16.vlgmr.msra.gmra.mxu0 %v1406_v5 }
 0x28a   :  { %2786 = vmatpush3.bf16.msra.mxu0 %v3081_v4  ;;  %1685 = vmatprep.mubr.bf16.mxu0 %v1407_v3 }
 0x28b   :  { %2787 = vmatprep.subr.bf16.mxu0 %v3082_v6  ;;  %v3145_v6 = vld [vmem:[#allocation21 + $0x38] sm:$0xff]  }
 0x28e   :  { %2788 = vmatpush3.bf16.msra.mxu0 %v3083_v7  ;;  %v2598_v7 = vld [vmem:[#allocation2] ss:$0 sm:$0xff] }
 0x28f   :  { %2789 = vmatprep.subr.bf16.mxu0 %v3084_v8 }
 0x292   :  { %2790 = vmatpush3.bf16.msra.mxu0 %v3085_v9 }
 0x293   :  { %2791 = vmatprep.subr.bf16.mxu0 %v3086_v10 }
 0x296   :  { %2792 = vmatpush3.bf16.msra.mxu0 %v3087_v11 }
 0x297   :  { %2793 = vmatprep.subr.bf16.mxu0 %v3088_v12 }
 0x29a   :  { %2794 = vmatpush3.bf16.msra.mxu0 %v3089_v13 }
 0x29b   :  { %2795 = vmatprep.subr.bf16.mxu0 %v3090_v14 }
 0x29e   :  { %2796 = vmatpush3.bf16.msra.mxu0 %v3091_v15 }
 0x29f   :  { %2797 = vmatprep.subr.bf16.mxu0 %v3092_v16  ;;  %v3779_v21 = vpop.f32.mrf.mxu1 }
 0x2a0   :  { %v1960_v63 = vadd.f32 %v3779_v21, %v1838_v56  ;;  %v3146_v21 = vld [vmem:[#allocation21 + $0x70] sm:$0xff]  }
 0x2a1   :  { %v1961_v22 = vpop.f32.mrf.mxu1 }
 0x2a2   :  { %2798 = vmatpush3.bf16.msra.mxu0 %v3093_v18  ;;  %v1962_v24 = vadd.f32 %v1961_v22, %v1842_v19  ;;  %v1966_v3 = vmax.f32 %v1960_v63, 0.0  ;;  %v3147_v22 = vld [vmem:[#allocation21 + $0x30] sm:$0xff]   ;;  %v3160_v63 = vld [vmem:[#allocation23 + $0x78] sm:$0xff]  }
 0x2a3   :  { %2799 = vmatprep.subr.bf16.mxu0 %v3094_v20  ;;  %v1963_v26 = vpop.f32.mrf.mxu1 }
 0x2a4   :  { %v1967_v27 = vmax.f32 %v1962_v24, 0.0  ;;  %v1968_v4 = vpack.c.bf16 %v1966_v3, %v1966_v3  ;;  %v3149_v24 = vld [vmem:[#allocation21 + $0x28] sm:$0xff]  }
 0x2a5   :  { %v1964_v28 = vpop.f32.mrf.mxu1 }
 0x2a6   :  { %2800 = vmatpush3.bf16.msra.mxu0 %v3095_v23  ;;  %v1969_v30 = vpack.c.bf16 %v1967_v27, %v1967_v27  ;;  %v3148_v23 = vld [vmem:[#allocation21 + $0x68] sm:$0xff]   ;;  %v3151_v27 = vld [vmem:[#allocation21 + $0x20] sm:$0xff]  }
 0x2a7   :  { %2141 = vmatprep.subr.bf16.mxu0 %v3098_v25  ;;  %v3150_v25 = vld [vmem:[#allocation21 + $0x60] sm:$0xff]  }
 0x2a9   :  { %1686 = vmatmul.mubr.bf16.vlgmr.msra.gmra.mxu0 %v1406_v5  ;;  %v3144_v5 = vld [vmem:[#allocation21 + $0x78] sm:$0xff]  }
 0x2aa   :  { %2142 = vmatpush1.bf16.msra.mxu0 %v3096_v29  ;;  %2173 = vmatprep.mubr.bf16.mxu0 %v1969_v30  ;;  %v3152_v30 = vld [vmem:[#allocation21 + $0x58] sm:$0xff]  }
 0x2ab   :  { %2143 = vmatprep.subr.bf16.mxu0 %v3101_v31  ;;  %2807 = vmatprep.subr.bf16.mxu1 %v3144_v5 }
 0x2ac   :  { %2808 = vmatpush3.bf16.msra.mxu1 %v3145_v6 }
 0x2ad   :  { %2809 = vmatprep.subr.bf16.mxu1 %v3146_v21 }
 0x2ae   :  { %2144 = vmatpush1.bf16.msra.mxu0 %v3099_v32 }
 0x2af   :  { %2145 = vmatprep.subr.bf16.mxu0 %v3104_v33 }
 0x2b0   :  { %2810 = vmatpush3.bf16.msra.mxu1 %v3147_v22 }
 0x2b1   :  { %2811 = vmatprep.subr.bf16.mxu1 %v3148_v23 }
 0x2b2   :  { %2146 = vmatpush1.bf16.msra.mxu0 %v3102_v34 }
 0x2b3   :  { %2147 = vmatprep.subr.bf16.mxu0 %v3107_v35 }
 0x2b4   :  { %2812 = vmatpush3.bf16.msra.mxu1 %v3149_v24 }
 0x2b5   :  { %2813 = vmatprep.subr.bf16.mxu1 %v3150_v25 }
 0x2b6   :  { %2148 = vmatpush1.bf16.msra.mxu0 %v3105_v36  ;;  %v3153_v36 = vld [vmem:[#allocation21 + $0x18] sm:$0xff]  }
 0x2b7   :  { %2149 = vmatprep.subr.bf16.mxu0 %v3110_v37 }
 0x2b8   :  { %2814 = vmatpush3.bf16.msra.mxu1 %v3151_v27 }
 0x2b9   :  { %2815 = vmatprep.subr.bf16.mxu1 %v3152_v30 }
 0x2ba   :  { %2150 = vmatpush1.bf16.msra.mxu0 %v3108_v38  ;;  %v3154_v38 = vld [vmem:[#allocation21 + $0x50] sm:$0xff]  }
 0x2bb   :  { %2151 = vmatprep.subr.bf16.mxu0 %v3113_v58 }
 0x2bc   :  { %2816 = vmatpush3.bf16.msra.mxu1 %v3153_v36 }
 0x2bd   :  { %2817 = vmatprep.subr.bf16.mxu1 %v3154_v38  ;;  %v2647_v38 = vld [vmem:[%s3839_s14] ss:$0 sm:$0xff] }
 0x2be   :  { %2152 = vmatpush1.bf16.msra.mxu0 %v3111_v39 }
 0x2bf   :  { %2153 = vmatprep.subr.bf16.mxu0 %v3116_v40  ;;  %v3155_v40 = vld [vmem:[#allocation21 + $0x10] sm:$0xff]  }
 0x2c0   :  { %2818 = vmatpush3.bf16.msra.mxu1 %v3155_v40 }
 0x2c2   :  { %2154 = vmatpush1.bf16.msra.mxu0 %v3114_v41 }
 0x2c3   :  { %2155 = vmatprep.subr.bf16.mxu0 %v3119_v42 }
 0x2c6   :  { %2156 = vmatpush1.bf16.msra.mxu0 %v3117_v43 }
 0x2c7   :  { %2157 = vmatprep.subr.bf16.mxu0 %v3122_v44 }
 0x2ca   :  { %2158 = vmatpush2.bf16.msra.mxu0 %v3120_v45  ;;  %v3156_v45 = vld [vmem:[#allocation21 + $0x48] sm:$0xff]  }
 0x2cb   :  { %2159 = vmatprep.subr.bf16.mxu0 %v3125_v46  ;;  %2819 = vmatprep.subr.bf16.mxu1 %v3156_v45 }
 0x2ce   :  { %2160 = vmatpush2.bf16.msra.mxu0 %v3123_v47  ;;  %v3157_v47 = vld [vmem:[#allocation21 + $0x8] sm:$0xff]  }
 0x2cf   :  { %2161 = vmatprep.subr.bf16.mxu0 %v3128_v48  ;;  %2820 = vmatpush3.bf16.msra.mxu1 %v3157_v47 }
 0x2d2   :  { %2162 = vmatpush2.bf16.msra.mxu0 %v3126_v49 }
 0x2d3   :  { %2163 = vmatprep.subr.bf16.mxu0 %v3131_v50  ;;  %v3158_v50 = vld [vmem:[#allocation21 + $0x40] sm:$0xff]  }
 0x2d4   :  { %2821 = vmatprep.subr.bf16.mxu1 %v3158_v50 }
 0x2d6   :  { %2164 = vmatpush2.bf16.msra.mxu0 %v3129_v51 }
 0x2d7   :  { %2165 = vmatprep.subr.bf16.mxu0 %v3134_v1 }
 0x2da   :  { %2166 = vmatpush2.bf16.msra.mxu0 %v3132_v52  ;;  %v3159_v52 = vld [vmem:[#allocation21] sm:$0xff]  }
 0x2db   :  { %2167 = vmatprep.subr.bf16.mxu0 %v3137_v53  ;;  %2822 = vmatpush3.bf16.msra.mxu1 %v3159_v52  ;;  %v1759_v52 = vld [vmem:[%s3845_s20] sm:$0x3] }
 0x2dc   :  { %2829 = vmatprep.subr.bf16.mxu1 %v3160_v63 }
 0x2de   :  { %2168 = vmatpush2.bf16.msra.mxu0 %v3135_v55 }
 0x2df   :  { %2169 = vmatprep.subr.bf16.mxu0 %v3140_v61 }
 0x2e2   :  { %2170 = vmatpush2.bf16.msra.mxu0 %v3138_v62 }
 0x2e3   :  { %2171 = vmatprep.subr.bf16.mxu0 %v3143_v0 }
 0x2e6   :  { %2172 = vmatpush2.bf16.msra.mxu0 %v3141_v2 }
 0x2e9   :  { %2174 = vmatmul.mubr.bf16.vlgmr.msra.gmra.mxu0 %v1968_v4 }
 0x303   :  { %v863_v8 = vpop.xlane.xlu0 %862 }
 0x304   :  { %v874_v9 = vadd.f32 %v2598_v7, %v863_v8 }
 0x306   :  { %v877_v10 = vsel %vm876_vm8, %v874_v9, 0.0  ;;  %v898_v11 = vsub.f32 0.0, %v874_v9 }
 0x307   :  { %v866_v12 = vpop.xlane.xlu0 %865  ;;  %v878_v37 = vrot.slane %v877_v10, 4 }
 0x308   :  { %v900_v13 = vand.u32 2147483647, %v898_v11  ;;  %v3785_v14 = vadd.f32 %v2598_v7, %v866_v12  ;;  %v899_v51 = vmax.f32 %v898_v11, 0.0 }
 0x309   :  { %v879_v41 = vadd.f32 %v878_v37, %v877_v10 }
 0x30a   :  { %v901_v15 = vsub.f32 0.0, %v900_v13  ;;  %v885_v16 = vmul.f32 1.442695, %v3785_v14  ;;  %v916_v17 = vand.u32 2147483647, %v3785_v14  ;;  %v915_v56 = vmax.f32 %v3785_v14, 0.0 }
 0x30b   :  { %v880_v44 = vrot.slane %v879_v41, 2 }
 0x30c   :  { %v902_v18 = vmul.f32 1.442695, %v901_v15  ;;  %3176 = vpow2.f32 %v885_v16  ;;  %v917_v19 = vsub.f32 0.0, %v916_v17 }
 0x30d   :  { %v881_v49 = vadd.f32 %v880_v44, %v879_v41 }
 0x30e   :  { %3178 = vpow2.f32 %v902_v18  ;;  %v918_v20 = vmul.f32 1.442695, %v917_v19 }
 0x30f   :  { %v882_v62 = vrot.slane %v881_v49, 1 }
 0x310   :  { %3180 = vpow2.f32 %v918_v20 }
 0x311   :  { %v883_v7 = vadd.f32 %v882_v62, %v881_v49 }
 0x313   :  { %v3793_v13 = vmul.f32 0.125, %v883_v7 }
 0x319   :  { %v3177_v26 = vpop.eup %3176 }
 0x31a   :  { %v887_v28 = vsel %vm876_vm8, %v3177_v26, 0.0 }
 0x31b   :  { %v3179_v29 = vpop.eup %3178  ;;  %v888_v31 = vrot.slane %v887_v28, 4 }
 0x31c   :  { %v904_v32 = vadd.f32 1.0, %v3179_v29 }
 0x31d   :  { %v3181_v33 = vpop.eup %3180  ;;  %v889_v34 = vadd.f32 %v888_v31, %v887_v28  ;;  %v2664_v28 = vld [vmem:[%s3841_s16] ss:$0 sm:$0xff] }
 0x31e   :  { %3182 = vlog2.f32 %v904_v32  ;;  %v920_v35 = vadd.f32 1.0, %v3181_v33  ;;  %v3201_v32 = vld [vmem:[#allocation3] sm:$0xff] }
 0x31f   :  { %v890_v58 = vrot.slane %v889_v34, 2  ;;  %v1049_v33 = vrot.slane %v3201_v32, 4 }
 0x320   :  { %3184 = vlog2.f32 %v920_v35 }
 0x321   :  { %v891_v39 = vadd.f32 %v890_v58, %v889_v34  ;;  %v1050_v36 = vadd.f32 %v3201_v32, %v1049_v33  ;;  %v1826_v33 = vrot.slane %v3751_v54, 4 }
 0x323   :  { %v892_v42 = vrot.slane %v891_v39, 1  ;;  %v1051_v58 = vrot.slane %v1050_v36, 2 }
 0x325   :  { %v893_v43 = vadd.f32 %v892_v42, %v891_v39  ;;  %v1052_v40 = vadd.f32 %v1051_v58, %v1050_v36  ;;  %v1827_v36 = vadd.f32 %v3751_v54, %v1826_v33 }
 0x327   :  { %v894_v46 = vmul.f32 0.125, %v893_v43  ;;  %v1053_v42 = vrot.slane %v1052_v40, 1  ;;  %v1828_v58 = vrot.slane %v1827_v36, 2 }
 0x329   :  { %3186 = vlog2.f32 %v894_v46  ;;  %v1054_v45 = vadd.f32 %v1053_v42, %v1052_v40 }
 0x32b   :  { %v3183_v48 = vpop.eup %3182  ;;  %v1055_v46 = vmul.f32 0.125, %v1054_v45 }
 0x32c   :  { %v906_v1 = vmul.f32 0.6931472, %v3183_v48 }
 0x32d   :  { %v3185_v53 = vpop.eup %3184 }
 0x32e   :  { %v907_v55 = vadd.f32 %v906_v1, %v899_v51  ;;  %v922_v61 = vmul.f32 0.6931472, %v3185_v53  ;;  %v1974_v53 = vrot.slane %v1759_v52, %v3738_v60  ;;  %v3164_v60 = vld [vmem:[#allocation23 + $0x68] sm:$0xff]  }
 0x330   :  { %v908_v0 = vsel %vm876_vm8, %v907_v55, 0.0  ;;  %v923_v2 = vadd.f32 %v922_v61, %v915_v56  ;;  %v1978_v55 = vrot.slane %v1759_v52, %v3735_v59  ;;  %v3165_v59 = vld [vmem:[#allocation23 + $0x28] sm:$0xff]  }
 0x331   :  { %v909_v3 = vrot.slane %v908_v0, 4 }
 0x332   :  { %v924_v4 = vsel %vm876_vm8, %v923_v2, 0.0 }
 0x333   :  { %v910_v5 = vadd.f32 %v909_v3, %v908_v0  ;;  %v925_v6 = vrot.slane %v924_v4, 4 }
 0x335   :  { %v926_v8 = vadd.f32 %v925_v6, %v924_v4  ;;  %v911_v9 = vrot.slane %v910_v5, 2  ;;  %v3161_v6 = vld [vmem:[#allocation23 + $0x38] sm:$0xff]  }
 0x336   :  { %v3187_v10 = vpop.eup %3186 }
 0x337   :  { %v912_v11 = vadd.f32 %v911_v9, %v910_v5  ;;  %v927_v12 = vrot.slane %v926_v8, 2  ;;  %v3795_v14 = vmul.f32 0.6931472, %v3187_v10  ;;  %v3163_v9 = vld [vmem:[#allocation23 + $0x30] sm:$0xff]   ;;  %v3166_v10 = vld [vmem:[#allocation23 + $0x60] sm:$0xff]  }
 0x339   :  { %v913_v15 = vrot.slane %v912_v11, 1  ;;  %v928_v16 = vadd.f32 %v927_v12, %v926_v8  ;;  %v897_v17 = vsub.f32 %v3793_v13, %v3795_v14  ;;  %v3162_v8 = vld [vmem:[#allocation23 + $0x70] sm:$0xff]   ;;  %v3168_v12 = vld [vmem:[#allocation23 + $0x58] sm:$0xff]  }
 0x33b   :  { %v929_v18 = vrot.slane %v928_v16, 1  ;;  %v914_v19 = vadd.f32 %v913_v15, %v912_v11  ;;  %v3167_v11 = vld [vmem:[#allocation23 + $0x20] sm:$0xff]   ;;  %v3169_v15 = vld [vmem:[#allocation23 + $0x18] sm:$0xff]  }
 0x33d   :  { %v930_v20 = vadd.f32 %v929_v18, %v928_v16  ;;  %v3170_v16 = vld [vmem:[#allocation23 + $0x50] sm:$0xff]  }
 0x33e   :  { %v3171_v18 = vld [vmem:[#allocation23 + $0x10] sm:$0xff]  }
 0x33f   :  { %v931_v21 = vadd.f32 %v930_v20, %v914_v19  ;;  %v3172_v19 = vld [vmem:[#allocation23 + $0x48] sm:$0xff]  }
 0x340   :  { %v3173_v20 = vld [vmem:[#allocation23 + $0x8] sm:$0xff]  }
 0x341   :  { %v932_v22 = vmul.f32 0.125, %v931_v21  ;;  %v3174_v21 = vld [vmem:[#allocation23 + $0x40] sm:$0xff]  }
 0x343   :  { %2500 = vperm.xlu0 %2870, %v932_v22   ;;  %v3175_v22 = vld [vmem:[#allocation23] sm:$0xff]  }
 0x349   :  { %v2779_v23 = vpop.f32.mrf.mxu0 }
 0x34b   :  { %v2780_v24 = vpop.f32.mrf.mxu0 }
 0x34c   :  { %v2781_v37 = vadd.f32 %v2780_v24, %v2779_v23 }
 0x34d   :  { %v2782_v25 = vpop.f32.mrf.mxu0 }
 0x34e   :  { %v1545_v39 = vadd.f32 %v2781_v37, %v2647_v38  ;;  %v2729_v37 = vld [vmem:[%s3847_s22] ss:$0 sm:$0xff]  ;;  %s3516_s22 = smov [#allocation24]  }
 0x34f   :  { %v2783_v26 = vpop.f32.mrf.mxu0 }
 0x369   :  { %v2801_v27 = vpop.f32.mrf.mxu0 }
 0x36b   :  { %v2802_v29 = vpop.f32.mrf.mxu0 }
 0x36c   :  { %v2803_v30 = vadd.f32 %v2802_v29, %v2801_v27 }
 0x36d   :  { %v2804_v31 = vpop.f32.mrf.mxu0 }
 0x36e   :  { %v1688_v34 = vadd.f32 %v2803_v30, %v2664_v28  ;;  %v2746_v28 = vld [vmem:[%s3849_s24] ss:$0 sm:$0xff]  ;;  %s2519_s24 = sshll.u32 %s3516_s22, 4  ;;  %s2520_s24 = int_to_ptr.vmem [resolvable:$true] %s2519_s24 }
 0x36f   :  { %v2805_v35 = vpop.f32.mrf.mxu0  ;;  %s3462_s7 = scalar_lea.vmem %s2520_s24, 16  ;;  %s3466_s15 = scalar_lea.vmem %s2520_s24, 32 }
 0x370   :  { %3188 = vtanh.f32 %v1688_v34  ;;  %p3463_p9 = scmp.ne.s32.totalorder %s2520_s24, %s3462_s7  ;;  %p3467_p10 = scmp.lt.s32.totalorder %s2520_s24, %s2520_s24 }
 0x371   :  { %3190 = vtanh.f32 %v1545_v39  ;;  %v1829_v39 = vadd.f32 %v1828_v58, %v1827_v36  ;;  %p3468_p11 = scmp.lt.s32.totalorder %s3466_s15, %s3462_s7 }
 0x373   :  { %v1830_v42 = vrot.slane %v1829_v39, 1  ;;  %p3469_p12 = por %p3468_p11, %p3467_p10 }
 0x375   :  { %p3470_p13 = pnand %p3469_p12, %p3463_p9 }
 0x37d   :  { %v3189_v41 = vpop.eup %3188 }
 0x37e   :  { %v1694_v43 = vsub.f32 0.0, %v3189_v41  ;;  %v3191_v47 = vpop.eup %3190 }
 0x37f   :  { %v1697_v48 = vsub.f32 %v3191_v47, %v1055_v46 }
 0x380   :  { %v1695_v44 = vmul.f32 1.442695, %v1694_v43 }
 0x381   :  { %v1698_v49 = vmul.f32 %v1697_v48, %v1697_v48 }
 0x382   :  { %3192 = vpow2.f32 %v1695_v44  ;;  %v1831_v44 = vadd.f32 %v1830_v42, %v1829_v39 }
 0x384   :  { %v1832_v45 = vmul.f32 0.125, %v1831_v44 }
 0x38f   :  { %v3193_v50 = vpop.eup %3192 }
 0x390   :  { %v1699_v51 = vmul.f32 %v3193_v50, %v1698_v49 }
 0x392   :  { %v1700_v1 = vadd.f32 %v3189_v41, %v1699_v51 }
 0x394   :  { %1701 = vadd.xlane.f32.xlu1 %v1700_v1 }
 0x3a9   :  { %v2175_v56 = vpop.f32.mrf.mxu0 }
 0x3aa   :  { %v2176_v61 = vadd.f32 %v2175_v56, %v1974_v53 }
 0x3ab   :  { %v2177_v62 = vpop.f32.mrf.mxu0 }
 0x3ac   :  { %v2178_v63 = vadd.f32 %v2177_v62, %v1978_v55  ;;  %v2182_v0 = vmax.f32 %v2176_v61, 0.0 }
 0x3ad   :  { %v2179_v2 = vpop.f32.mrf.mxu0 }
 0x3ae   :  { %v2183_v3 = vmax.f32 %v2178_v63, 0.0  ;;  %v2184_v7 = vpack.c.bf16 %v2182_v0, %v2182_v0 }
 0x3af   :  { %v2180_v4 = vpop.f32.mrf.mxu0 }
 0x3b0   :  { %v2185_v5 = vpack.c.bf16 %v2183_v3, %v2183_v3  ;;  %v2489_v3 = vand.u32 127, %v543_v57 }
 0x3b2   :  { %2320 = vmatprep.mubr.bf16.mxu1 %v2185_v5  ;;  %vm2495_vm9 = vcmp.eq.s32.totalorder %v2489_v3, 5  ;;  %vm2494_vm10 = vcmp.eq.s32.totalorder %v2489_v3, 4  ;;  %vm2493_vm11 = vcmp.eq.s32.totalorder %v2489_v3, 3  ;;  %vm2492_vm12 = vcmp.eq.s32.totalorder %v2489_v3, 2 }
 0x3b3   :  { %2321 = vmatmul.mubr.bf16.vlgmr.msra.gmra.mxu1 %v2184_v7  ;;  %vm2491_vm13 = vcmp.eq.s32.totalorder %v2489_v3, 1  ;;  %vm2490_vm14 = vcmp.eq.s32.totalorder %v2489_v3, 0 }
 0x3b4   :  { %2830 = vmatpush3.bf16.msra.mxu1 %v3161_v6  ;;  %2463 = vmatprep.mubr.bf16.mxu1 %v2185_v5 }
 0x3b5   :  { %2831 = vmatprep.subr.bf16.mxu1 %v3162_v8 }
 0x3b8   :  { %2832 = vmatpush3.bf16.msra.mxu1 %v3163_v9 }
 0x3b9   :  { %2833 = vmatprep.subr.bf16.mxu1 %v3164_v60 }
 0x3bc   :  { %2834 = vmatpush3.bf16.msra.mxu1 %v3165_v59 }
 0x3bd   :  { %2835 = vmatprep.subr.bf16.mxu1 %v3166_v10 }
 0x3c0   :  { %2836 = vmatpush3.bf16.msra.mxu1 %v3167_v11 }
 0x3c1   :  { %2837 = vmatprep.subr.bf16.mxu1 %v3168_v12 }
 0x3c4   :  { %2838 = vmatpush3.bf16.msra.mxu1 %v3169_v15 }
 0x3c5   :  { %2839 = vmatprep.subr.bf16.mxu1 %v3170_v16 }
 0x3c8   :  { %2840 = vmatpush3.bf16.msra.mxu1 %v3171_v18 }
 0x3c9   :  { %2841 = vmatprep.subr.bf16.mxu1 %v3172_v19 }
 0x3cc   :  { %2842 = vmatpush3.bf16.msra.mxu1 %v3173_v20 }
 0x3cd   :  { %2843 = vmatprep.subr.bf16.mxu1 %v3174_v21 }
 0x3d0   :  { %2844 = vmatpush3.bf16.msra.mxu1 %v3175_v22 }
 0x3d3   :  { %2464 = vmatmul.mubr.bf16.vlgmr.msra.gmra.mxu1 %v2184_v7 }
 0x41d   :  { %v1702_v51 = vpop.xlane.xlu1 %1701 }
 0x41e   :  { %v1703_v1 = vrot.slane %v1702_v51, 4 }
 0x420   :  { %v1704_v52 = vadd.f32 %v1703_v1, %v1702_v51 }
 0x422   :  { %v1705_v53 = vrot.slane %v1704_v52, 2 }
 0x424   :  { %v1706_v61 = vadd.f32 %v1705_v53, %v1704_v52 }
 0x426   :  { %v1707_v0 = vrot.slane %v1706_v61, 1 }
 0x428   :  { %v1708_v5 = vadd.f32 %v1707_v0, %v1706_v61 }
 0x42a   :  { %v1709_v13 = vmul.f32 0.125, %v1708_v5 }
 0x473   :  { %v2823_v23 = vpop.f32.mrf.mxu1 }
 0x475   :  { %v2824_v24 = vpop.f32.mrf.mxu1 }
 0x476   :  { %v2825_v35 = vadd.f32 %v2824_v24, %v2823_v23 }
 0x477   :  { %v2826_v25 = vpop.f32.mrf.mxu1 }
 0x478   :  { %v2323_v38 = vadd.f32 %v2825_v35, %v2729_v37 }
 0x479   :  { %v2827_v26 = vpop.f32.mrf.mxu1 }
 0x493   :  { %v2845_v27 = vpop.f32.mrf.mxu1 }
 0x495   :  { %v2846_v29 = vpop.f32.mrf.mxu1 }
 0x496   :  { %v2847_v30 = vadd.f32 %v2846_v29, %v2845_v27 }
 0x497   :  { %v2848_v31 = vpop.f32.mrf.mxu1 }
 0x498   :  { %v2466_v32 = vadd.f32 %v2847_v30, %v2746_v28 }
 0x499   :  { %v2849_v34 = vpop.f32.mrf.mxu1 }
 0x49a   :  { %3194 = vtanh.f32 %v2466_v32 }
 0x49b   :  { %3196 = vtanh.f32 %v2323_v38 }
 0x4a7   :  { %v3195_v40 = vpop.eup %3194 }
 0x4a8   :  { %v2472_v41 = vsub.f32 0.0, %v3195_v40  ;;  %v3197_v46 = vpop.eup %3196 }
 0x4a9   :  { %v2475_v47 = vsub.f32 %v3197_v46, %v1832_v45 }
 0x4aa   :  { %v2473_v43 = vmul.f32 1.442695, %v2472_v41 }
 0x4ab   :  { %v2476_v48 = vmul.f32 %v2475_v47, %v2475_v47 }
 0x4ac   :  { %3198 = vpow2.f32 %v2473_v43 }
 0x4b9   :  { %v3199_v49 = vpop.eup %3198 }
 0x4ba   :  { %v2477_v54 = vmul.f32 %v3199_v49, %v2476_v48 }
 0x4bc   :  { %v2478_v50 = vadd.f32 %v3195_v40, %v2477_v54 }
 0x4be   :  { %2479 = vadd.xlane.f32.xlu1 %v2478_v50 }
 0x4cf   :  { %2508 = vperm.xlu1 %2871, %v897_v17   ;;  %v2501_v17 = vpop.permute.xlu0 %2500 }
 0x547   :  { %v2480_v55 = vpop.xlane.xlu1 %2479 }
 0x548   :  { %v2481_v56 = vrot.slane %v2480_v55, 4 }
 0x54a   :  { %v2482_v62 = vadd.f32 %v2481_v56, %v2480_v55 }
 0x54b   :  { %v2509_v57 = vpop.permute.xlu1 %2508 }
 0x54c   :  { %v2483_v63 = vrot.slane %v2482_v62, 2 }
 0x54e   :  { %v2484_v2 = vadd.f32 %v2483_v63, %v2482_v62 }
 0x550   :  { %v2485_v4 = vrot.slane %v2484_v2, 1 }
 0x552   :  { %v2486_v6 = vadd.f32 %v2485_v4, %v2484_v2 }
 0x554   :  { %v2487_v7 = vmul.f32 0.125, %v2486_v6 }
 0x556   :  { %v2496_v14 = vsel %vm2495_vm9, %v2487_v7, 0.0 }
 0x557   :  { %v2497_v8 = vsel %vm2494_vm10, %v1709_v13, %v2496_v14 }
 0x558   :  { %v2503_v9 = vsel %vm2493_vm11, %v2501_v17, %v2497_v8 }
 0x559   :  { %v2504_v60 = vsel %vm2492_vm12, 0.0, %v2503_v9 }
 0x55a   :  { %v2505_v59 = vsel %vm2491_vm13, 0.0, %v2504_v60 }
 0x55b   :  { %v2511_v10 = vsel %vm2490_vm14, %v2509_v57, %v2505_v59 }
 0x55c   :  { %2512 = vst [vmem:[#allocation24] sm:$0x1] %v2511_v10 }
 0x55d   :  { %3473 = shalt.err (!%p3470_p13)
}
 0x55e   :  { %2522 = dma.vmem_to_hbm [thread:$0]  %s2520_s24, 16, %s3850_s25, [#allocation5]  }
 0x55f   :  { %3496 = dma.done.wait [#allocation5], 16  }
 0x560   :  { %3497 = vsyncadd [#allocation5], 4294967280 }
 0x561   :  { %2526 = vsyncpa [#allocation4], 1 }
 0x562   :  { %2527 = vsyncpa [#allocation7], 1 }
 0x563   :  { %2528 = vsyncpa [#allocation10], 1 }
 0x564   :  { %2529 = vsyncpa [#allocation13], 1 }
 0x565   :  { %2530 = vsyncpa [#allocation16], 1 }
 0x566   :  { %2531 = vsyncpa [#allocation19], 1 }
 0x567   :  { %2532 = vsyncpa [#allocation22], 1 }
 0x568   :  { %2533 = vsyncpa [#allocation5], 1 }

</bundles_post_ra>
